<compile_context>
chip_gen: v7x
topology: tpu7x:2x2x1
jax: 0.10.0
libtpu: 0.0.40
codegen_flags: <defaults>
</compile_context>

<pallas_src>
import jax
import jax.numpy as jnp
from jax import lax
from jax.experimental import pallas as pl
from jax.experimental.pallas import tpu as pltpu


_VMEM_LIMIT = 48 << 20          # raised scoped-VMEM cap (v5e default is 16 MiB)
_CHUNK_VMEM_BUDGET = 24 << 20   # budget used to size the recurrence time-chunk


# ----------------------------------------------------------------------------
# Generic tiled matmul + bias kernel (vocab head).
# ----------------------------------------------------------------------------
def _matmul_bias_kernel(a_ref, b_ref, bias_ref, o_ref):
    o_ref[...] = (
        jnp.dot(a_ref[...], b_ref[...], preferred_element_type=jnp.float32)
        + bias_ref[...]
    ).astype(o_ref.dtype)


def _pick_tile(dim, cap, align):
    """Largest tile <= cap that divides dim and is a multiple of `align`;
    falls back to the full dim (full-dim blocks are always legal)."""
    if dim <= cap:
        return dim
    t = (cap // align) * align
    while t >= align:
        if dim % t == 0:
            return t
        t -= align
    return dim


def _matmul_bias(a, b, bias, *, tm_cap=1024, tn_cap=512, out_dtype=jnp.float32):
    """a: (M,K), b: (K,N), bias: (1,N) -> (M,N).  K kept untiled (small here)."""
    M, K = a.shape
    _, N = b.shape
    TM = _pick_tile(M, tm_cap, 8)
    TN = _pick_tile(N, tn_cap, 128)
    grid = (M // TM, N // TN)
    return pl.pallas_call(
        _matmul_bias_kernel,
        out_shape=jax.ShapeDtypeStruct((M, N), out_dtype),
        grid_spec=pltpu.PrefetchScalarGridSpec(
            num_scalar_prefetch=0,
            grid=grid,
            in_specs=[
                pl.BlockSpec((TM, K), lambda i, j: (i, 0)),
                pl.BlockSpec((K, TN), lambda i, j: (0, j)),
                pl.BlockSpec((1, TN), lambda i, j: (0, j)),
            ],
            out_specs=pl.BlockSpec((TM, TN), lambda i, j: (i, j)),
        ),
        compiler_params=pltpu.CompilerParams(
            dimension_semantics=("parallel", "parallel"),
            vmem_limit_bytes=_VMEM_LIMIT),
    )(a, b, bias)


# ----------------------------------------------------------------------------
# Fused input-projection + LSTM recurrence kernel.
# Inputs are 2D time-major (S*B, ...) so everything lowers to plain 2D matmuls
# and aligned dynamic slices (no in-kernel reshapes).
# ----------------------------------------------------------------------------
def _lstm_fused_kernel(emb_ref, h0_ref, c0_ref, wih_ref, whh_ref, bias_ref,
                       hs_ref, hN_ref, cN_ref,
                       gates_sc, hbuf_sc, h_sc, c_sc):
    chunk = pl.program_id(0)
    H = whh_ref.shape[0]
    B = h0_ref.shape[0]
    TcB = emb_ref.shape[0]
    Tc = TcB // B

    @pl.when(chunk == 0)
    def _():
        h_sc[...] = h0_ref[...]
        c_sc[...] = c0_ref[...]

    # Input projection for the whole chunk: ONE MXU matmul (hoisted out of the
    # serial loop).  Result lives only in VMEM -> no (S,B,4H) HBM round trip.
    gates_sc[...] = (
        jnp.dot(emb_ref[...], wih_ref[...], preferred_element_type=jnp.float32)
        + bias_ref[...])

    def step(t, carry):
        h, c = carry
        r = pl.multiple_of(t * B, B)                 # sublane-aligned row offset
        gates = gates_sc[pl.ds(r, B), :] + jnp.dot(
            h.astype(whh_ref.dtype), whh_ref[...],
            preferred_element_type=jnp.float32)
        i = jax.nn.sigmoid(gates[:, 0:H])
        f = jax.nn.sigmoid(gates[:, H:2 * H])
        g = jnp.tanh(gates[:, 2 * H:3 * H])
        o = jax.nn.sigmoid(gates[:, 3 * H:4 * H])
        c = f * c + i * g
        h = o * jnp.tanh(c)
        hbuf_sc[pl.ds(r, B), :] = h                  # full f32 sublane tile (B=8)
        return (h, c)

    # Tc is capped at 32 by the chunk-size picker -> always fully unrolled.
    h, c = lax.fori_loop(0, Tc, step, (h_sc[...], c_sc[...]), unroll=True)
    h_sc[...] = h
    c_sc[...] = c

    # One bulk cast + lane-dense store of the whole chunk's hidden states.
    hs_ref[...] = hbuf_sc[...].astype(hs_ref.dtype)

    # Only the last chunk writes the final state (resident output blocks).
    @pl.when(chunk == pl.num_programs(0) - 1)
    def _():
        hN_ref[...] = h
        cN_ref[...] = c


def _pick_chunk(S, B, E, H, *, max_unroll=32, vmem_budget=_CHUNK_VMEM_BUDGET):
    """Largest divisor Tc of S with Tc <= max_unroll whose VMEM footprint
    (double-buffered chunk I/O + scratch + weights) fits the budget."""
    G = 4 * H

    def vmem_bytes(tc):
        rows = tc * B
        return (2 * rows * E * 2          # embed chunk in (bf16, double-buffered)
                + 2 * rows * H * 2        # hs chunk out (bf16, double-buffered)
                + rows * G * 4            # gates scratch (f32)
                + rows * H * 4            # h-buffer scratch (f32)
                + 2 * (E * G + H * G) * 2  # W_ih^T / W_hh^T (bf16, dbl-buffered)
                + 4 * B * H * 4)          # h0/c0 in + h/c scratch (f32)

    best = 1
    for tc in range(1, min(S, max_unroll) + 1):
        if S % tc == 0 and vmem_bytes(tc) <= vmem_budget:
            best = tc
    return best


def _lstm_fused(embed_2d, h0, c0, wih_t, whh_t, bias, S, B):
    """embed_2d: (S*B, E) bf16 time-major; h0/c0: (B,H) f32;
    wih_t: (E,4H) bf16; whh_t: (H,4H) bf16; bias: (1,4H) f32.
    Returns hs (S*B, H) bf16 and final (h, c) in f32."""
    E = embed_2d.shape[1]
    H = whh_t.shape[0]
    G = 4 * H
    Tc = _pick_chunk(S, B, E, H)
    n_chunks = S // Tc
    TcB = Tc * B

    return pl.pallas_call(
        _lstm_fused_kernel,
        out_shape=(
            jax.ShapeDtypeStruct((S * B, H), jnp.bfloat16),   # all hidden states
            jax.ShapeDtypeStruct((B, H), jnp.float32),        # h_N
            jax.ShapeDtypeStruct((B, H), jnp.float32),        # c_N
        ),
        grid_spec=pltpu.PrefetchScalarGridSpec(
            num_scalar_prefetch=0,
            grid=(n_chunks,),
            in_specs=[
                pl.BlockSpec((TcB, E), lambda c: (c, 0)),     # embed chunk
                pl.BlockSpec((B, H), lambda c: (0, 0)),       # h0
                pl.BlockSpec((B, H), lambda c: (0, 0)),       # c0
                pl.BlockSpec((E, G), lambda c: (0, 0)),       # W_ih^T (bf16)
                pl.BlockSpec((H, G), lambda c: (0, 0)),       # W_hh^T (bf16)
                pl.BlockSpec((1, G), lambda c: (0, 0)),       # bias (f32)
            ],
            out_specs=[
                pl.BlockSpec((TcB, H), lambda c: (c, 0)),     # hs chunk
                pl.BlockSpec((B, H), lambda c: (0, 0)),       # h_N (resident)
                pl.BlockSpec((B, H), lambda c: (0, 0)),       # c_N (resident)
            ],
            scratch_shapes=[
                pltpu.VMEM((TcB, G), jnp.float32),            # gates chunk
                pltpu.VMEM((TcB, H), jnp.float32),            # hidden-state buffer
                pltpu.VMEM((B, H), jnp.float32),              # h carry
                pltpu.VMEM((B, H), jnp.float32),              # c carry
            ],
        ),
        compiler_params=pltpu.CompilerParams(
            dimension_semantics=("arbitrary",),               # time is serial
            vmem_limit_bytes=_VMEM_LIMIT),
    )(embed_2d, h0, c0, wih_t, whh_t, bias)


# ----------------------------------------------------------------------------
# Full forward pass (Embedding -> LSTM -> Linear), torch semantics.
# ----------------------------------------------------------------------------
def rnn_model_forward(x_tokens, prev_state, params):
    """x_tokens: (seq, batch) int32; prev_state: (h0, c0) each (1, batch, H)."""
    emb_table = params["embedding"]            # (V, E)
    w_ih = params["w_ih"]                      # (4H, E)  torch layout
    w_hh = params["w_hh"]                      # (4H, H)
    b_ih = params["b_ih"]                      # (4H,)
    b_hh = params["b_hh"]                      # (4H,)
    w_d = params["w_dense"]                    # (V, H)
    b_d = params["b_dense"]                    # (V,)

    S, B = x_tokens.shape
    V, E = emb_table.shape
    H = w_hh.shape[1]

    # 1) Embedding gather (plain JAX glue): gather f32 rows, cast only the
    #    gathered rows to bf16 (no full-table cast / HBM round trip).
    # TODO(synk): fuse the gather into the recurrence kernel via scalar-
    #             prefetched token ids + pl.Element row gather.
    embed = jnp.take(emb_table, x_tokens.reshape(-1),
                     axis=0).astype(jnp.bfloat16)                # (S*B, E) bf16

    # 2+3) Fused input projection + serial LSTM recurrence (single kernel).
    wih_t = w_ih.T.astype(jnp.bfloat16)                          # (E, 4H)
    whh_t = w_hh.T.astype(jnp.bfloat16)                          # (H, 4H)
    bias = (b_ih + b_hh).astype(jnp.float32).reshape(1, 4 * H)   # (1, 4H)
    h0, c0 = prev_state                                          # (1, B, H) each
    hs, h_n, c_n = _lstm_fused(embed, h0[0], c0[0], wih_t, whh_t, bias, S, B)

    # 4) Batched vocab projection: logits = hs @ W_dense^T + b_dense.
    wd_t = w_d.T.astype(jnp.bfloat16)                            # (H, V)
    bd = b_d.astype(jnp.float32).reshape(1, V)                   # (1, V)
    logits = _matmul_bias(hs, wd_t, bd,
                          tm_cap=1024, tn_cap=512).reshape(S, B, V)

    return logits, (h_n[None], c_n[None])


# ----------------------------------------------------------------------------
# Pure-JAX f32 reference matching torch.nn.LSTM semantics (gate order i,f,g,o).
# ----------------------------------------------------------------------------
def _reference_forward(x_tokens, prev_state, params):
    emb = jnp.take(params["embedding"], x_tokens, axis=0)        # (S,B,E)
    H = params["w_hh"].shape[1]
    wih_t, whh_t = params["w_ih"].T, params["w_hh"].T
    bias = params["b_ih"] + params["b_hh"]

    def step(carry, x_t):
        h, c = carry
        gates = x_t @ wih_t + h @ whh_t + bias
        i = jax.nn.sigmoid(gates[:, 0:H])
        f = jax.nn.sigmoid(gates[:, H:2 * H])
        g = jnp.tanh(gates[:, 2 * H:3 * H])
        o = jax.nn.sigmoid(gates[:, 3 * H:4 * H])
        c = f * c + i * g
        h = o * jnp.tanh(c)
        return (h, c), h

    h0, c0 = prev_state
    (h_n, c_n), outs = jax.lax.scan(step, (h0[0], c0[0]), emb)
    logits = outs @ params["w_dense"].T + params["b_dense"]
    return logits, (h_n[None], c_n[None])


def init_params(key, n_vocab, embedding_size, rnn_size):
    ks = jax.random.split(key, 7)
    s = 0.1
    return {
        "embedding": jax.random.normal(ks[0], (n_vocab, embedding_size), jnp.float32) * s,
        "w_ih": jax.random.normal(ks[1], (4 * rnn_size, embedding_size), jnp.float32) * s,
        "w_hh": jax.random.normal(ks[2], (4 * rnn_size, rnn_size), jnp.float32) * s,
        "b_ih": jax.random.normal(ks[3], (4 * rnn_size,), jnp.float32) * s,
        "b_hh": jax.random.normal(ks[4], (4 * rnn_size,), jnp.float32) * s,
        "w_dense": jax.random.normal(ks[5], (n_vocab, rnn_size), jnp.float32) * s,
        "b_dense": jax.random.normal(ks[6], (n_vocab,), jnp.float32) * s,
    }


if __name__ == "__main__":
    # Small shapes, lane/sublane friendly: V, H multiples of 128; B multiple of 8.
    n_vocab, seq_size, embedding_size, rnn_size, batch = 128, 8, 32, 128, 8

    key = jax.random.PRNGKey(0)
    k_param, k_tok = jax.random.split(key)
    params = init_params(k_param, n_vocab, embedding_size, rnn_size)

    x = jax.random.randint(k_tok, (seq_size, batch), 0, n_vocab, dtype=jnp.int32)
    zero_state = (jnp.zeros((1, batch, rnn_size), jnp.float32),
                  jnp.zeros((1, batch, rnn_size), jnp.float32))

    logits, (h_n, c_n) = jax.block_until_ready(
        rnn_model_forward(x, zero_state, params))

    ref_logits, (ref_h, ref_c) = _reference_forward(x, zero_state, params)
    assert logits.shape == (seq_size, batch, n_vocab)
    assert h_n.shape == (1, batch, rnn_size) and c_n.shape == (1, batch, rnn_size)
    # bf16 MXU operands (f32 accumulation) vs f32 reference -> loosened tolerance.
    assert jnp.allclose(logits, ref_logits, atol=5e-2, rtol=5e-2), \
        float(jnp.max(jnp.abs(logits - ref_logits)))
    assert jnp.allclose(h_n, ref_h, atol=5e-2, rtol=5e-2)
    assert jnp.allclose(c_n, ref_c, atol=5e-2, rtol=5e-2)

    print("KERNEL_OK")
</pallas_src>

<mosaic_0001>
module attributes {stable_mosaic.version = 11 : i64} {
  func.func @_lstm_fused_kernel(%arg0: i32, %arg1: memref<64x32xbf16, #tpu.memory_space<vmem>>, %arg2: memref<8x128xf32, #tpu.memory_space<vmem>>, %arg3: memref<8x128xf32, #tpu.memory_space<vmem>>, %arg4: memref<32x512xbf16, #tpu.memory_space<vmem>>, %arg5: memref<128x512xbf16, #tpu.memory_space<vmem>>, %arg6: memref<1x512xf32, #tpu.memory_space<vmem>>, %arg7: memref<64x128xbf16, #tpu.memory_space<vmem>>, %arg8: memref<8x128xf32, #tpu.memory_space<vmem>>, %arg9: memref<8x128xf32, #tpu.memory_space<vmem>>, %arg10: memref<64x512xf32, #tpu.memory_space<vmem>>, %arg11: memref<64x128xf32, #tpu.memory_space<vmem>>, %arg12: memref<8x128xf32, #tpu.memory_space<vmem>>, %arg13: memref<8x128xf32, #tpu.memory_space<vmem>>) attributes {dimension_semantics = [#tpu.dimension_semantics<arbitrary>], iteration_bounds = array<i64: 1>, scalar_prefetch = 0 : i64, scratch_operands = 4 : i64, tpu.core_type = #tpu.core_type<tc>, window_params = [{transform_indices = @transform_0, window_bounds = array<i64: 64, 32>}, {pipeline_mode = #tpu.pipeline_mode<synchronous>, transform_indices = @transform_1, window_bounds = array<i64: 8, 128>}, {pipeline_mode = #tpu.pipeline_mode<synchronous>, transform_indices = @transform_2, window_bounds = array<i64: 8, 128>}, {pipeline_mode = #tpu.pipeline_mode<synchronous>, transform_indices = @transform_3, window_bounds = array<i64: 32, 512>}, {pipeline_mode = #tpu.pipeline_mode<synchronous>, transform_indices = @transform_4, window_bounds = array<i64: 128, 512>}, {pipeline_mode = #tpu.pipeline_mode<synchronous>, transform_indices = @transform_5, window_bounds = array<i64: 1, 512>}, {transform_indices = @transform_6, window_bounds = array<i64: 64, 128>}, {pipeline_mode = #tpu.pipeline_mode<synchronous>, transform_indices = @transform_7, window_bounds = array<i64: 8, 128>}, {pipeline_mode = #tpu.pipeline_mode<synchronous>, transform_indices = @transform_8, window_bounds = array<i64: 8, 128>}]} {
    %c0_i32 = arith.constant 0 : i32
    %0 = arith.cmpi eq, %arg0, %c0_i32 : i32
    %1 = arith.extui %0 : i1 to i32
    %c0_i32_0 = arith.constant 0 : i32
    %2 = arith.cmpi ne, %1, %c0_i32_0 : i32
    scf.if %2 {
      %c0_95 = arith.constant 0 : index
      %c0_96 = arith.constant 0 : index
      %300 = vector.load %arg2[%c0_95, %c0_96] : memref<8x128xf32, #tpu.memory_space<vmem>>, vector<8x128xf32>
      %c0_97 = arith.constant 0 : index
      %c0_98 = arith.constant 0 : index
      %301 = vector.load %arg12[%c0_97, %c0_98] : memref<8x128xf32, #tpu.memory_space<vmem>>, vector<8x128xf32>
      tpu.vector_store %arg12[%c0_97, %c0_98], %300 {strides = array<i32>} : memref<8x128xf32, #tpu.memory_space<vmem>>, vector<8x128xf32>,
      %c0_99 = arith.constant 0 : index
      %c0_100 = arith.constant 0 : index
      %302 = vector.load %arg3[%c0_99, %c0_100] : memref<8x128xf32, #tpu.memory_space<vmem>>, vector<8x128xf32>
      %c0_101 = arith.constant 0 : index
      %c0_102 = arith.constant 0 : index
      %303 = vector.load %arg13[%c0_101, %c0_102] : memref<8x128xf32, #tpu.memory_space<vmem>>, vector<8x128xf32>
      tpu.vector_store %arg13[%c0_101, %c0_102], %302 {strides = array<i32>} : memref<8x128xf32, #tpu.memory_space<vmem>>, vector<8x128xf32>,
    } else {
    }
    %c0 = arith.constant 0 : index
    %c0_1 = arith.constant 0 : index
    %3 = vector.load %arg1[%c0, %c0_1] : memref<64x32xbf16, #tpu.memory_space<vmem>>, vector<64x32xbf16>
    %c0_2 = arith.constant 0 : index
    %c0_3 = arith.constant 0 : index
    %4 = vector.load %arg4[%c0_2, %c0_3] : memref<32x512xbf16, #tpu.memory_space<vmem>>, vector<32x512xbf16>
    %cst = arith.constant dense<0.000000e+00> : vector<64x512xf32>
    %5 = tpu.matmul %3, %4, %cst {dimension_numbers = #tpu.dot_dimension_numbers<[1], [0], [0], [1], [0, 0, 1, 1], [], []>} : vector<64x32xbf16>, vector<32x512xbf16>, vector<64x512xf32> -> vector<64x512xf32>
    %c0_4 = arith.constant 0 : index
    %c0_5 = arith.constant 0 : index
    %6 = vector.load %arg6[%c0_4, %c0_5] : memref<1x512xf32, #tpu.memory_space<vmem>>, vector<1x512xf32>
    %7 = vector.broadcast %6 : vector<1x512xf32> to vector<64x512xf32>
    %8 = arith.addf %5, %7 : vector<64x512xf32>
    %c0_6 = arith.constant 0 : index
    %c0_7 = arith.constant 0 : index
    %9 = vector.load %arg10[%c0_6, %c0_7] : memref<64x512xf32, #tpu.memory_space<vmem>>, vector<64x512xf32>
    tpu.vector_store %arg10[%c0_6, %c0_7], %8 {strides = array<i32>} : memref<64x512xf32, #tpu.memory_space<vmem>>, vector<64x512xf32>,
    %c0_8 = arith.constant 0 : index
    %c0_9 = arith.constant 0 : index
    %10 = vector.load %arg12[%c0_8, %c0_9] : memref<8x128xf32, #tpu.memory_space<vmem>>, vector<8x128xf32>
    %c0_10 = arith.constant 0 : index
    %c0_11 = arith.constant 0 : index
    %11 = vector.load %arg13[%c0_10, %c0_11] : memref<8x128xf32, #tpu.memory_space<vmem>>, vector<8x128xf32>
    %c0_i32_12 = arith.constant 0 : i32
    %c8_i32 = arith.constant 8 : i32
    %12 = arith.muli %c0_i32_12, %c8_i32 : i32
    %13 = tpu.assume_multiple %12, 8 : i32
    %14 = arith.index_cast %13 : i32 to index
    %c0_13 = arith.constant 0 : index
    %15 = vector.load %arg10[%14, %c0_13] : memref<64x512xf32, #tpu.memory_space<vmem>>, vector<8x512xf32>
    %16 = arith.truncf %10 : vector<8x128xf32> to vector<8x128xbf16>
    %c0_14 = arith.constant 0 : index
    %c0_15 = arith.constant 0 : index
    %17 = vector.load %arg5[%c0_14, %c0_15] : memref<128x512xbf16, #tpu.memory_space<vmem>>, vector<128x512xbf16>
    %cst_16 = arith.constant dense<0.000000e+00> : vector<8x512xf32>
    %18 = tpu.matmul %16, %17, %cst_16 {dimension_numbers = #tpu.dot_dimension_numbers<[1], [0], [0], [1], [0, 0, 1, 1], [], []>} : vector<8x128xbf16>, vector<128x512xbf16>, vector<8x512xf32> -> vector<8x512xf32>
    %19 = arith.addf %15, %18 : vector<8x512xf32>
    %20 = vector.extract_strided_slice %19 {offsets = [0, 0], sizes = [8, 128], strides = [1, 1]} : vector<8x512xf32> to vector<8x128xf32>
    %21 = arith.negf %20 : vector<8x128xf32>
    %22 = math.exp %21 : vector<8x128xf32>
    %cst_17 = arith.constant 1.000000e+00 : f32
    %23 = vector.broadcast %cst_17 : f32 to vector<8x128xf32>
    %24 = arith.addf %23, %22 : vector<8x128xf32>
    %25 = arith.divf %23, %24 : vector<8x128xf32>
    %26 = vector.extract_strided_slice %19 {offsets = [0, 128], sizes = [8, 128], strides = [1, 1]} : vector<8x512xf32> to vector<8x128xf32>
    %27 = arith.negf %26 : vector<8x128xf32>
    %28 = math.exp %27 : vector<8x128xf32>
    %cst_18 = arith.constant 1.000000e+00 : f32
    %29 = vector.broadcast %cst_18 : f32 to vector<8x128xf32>
    %30 = arith.addf %29, %28 : vector<8x128xf32>
    %31 = arith.divf %29, %30 : vector<8x128xf32>
    %32 = vector.extract_strided_slice %19 {offsets = [0, 256], sizes = [8, 128], strides = [1, 1]} : vector<8x512xf32> to vector<8x128xf32>
    %33 = math.tanh %32 : vector<8x128xf32>
    %34 = vector.extract_strided_slice %19 {offsets = [0, 384], sizes = [8, 128], strides = [1, 1]} : vector<8x512xf32> to vector<8x128xf32>
    %35 = arith.negf %34 : vector<8x128xf32>
    %36 = math.exp %35 : vector<8x128xf32>
    %cst_19 = arith.constant 1.000000e+00 : f32
    %37 = vector.broadcast %cst_19 : f32 to vector<8x128xf32>
    %38 = arith.addf %37, %36 : vector<8x128xf32>
    %39 = arith.divf %37, %38 : vector<8x128xf32>
    %40 = arith.mulf %31, %11 : vector<8x128xf32>
    %41 = arith.mulf %25, %33 : vector<8x128xf32>
    %42 = arith.addf %40, %41 : vector<8x128xf32>
    %43 = math.tanh %42 : vector<8x128xf32>
    %44 = arith.mulf %39, %43 : vector<8x128xf32>
    %45 = arith.index_cast %13 : i32 to index
    %c0_20 = arith.constant 0 : index
    %46 = vector.load %arg11[%45, %c0_20] : memref<64x128xf32, #tpu.memory_space<vmem>>, vector<8x128xf32>
    tpu.vector_store %arg11[%45, %c0_20], %44 {strides = array<i32>} : memref<64x128xf32, #tpu.memory_space<vmem>>, vector<8x128xf32>,
    %c1_i32 = arith.constant 1 : i32
    %c8_i32_21 = arith.constant 8 : i32
    %47 = arith.muli %c1_i32, %c8_i32_21 : i32
    %48 = tpu.assume_multiple %47, 8 : i32
    %49 = arith.index_cast %48 : i32 to index
    %c0_22 = arith.constant 0 : index
    %50 = vector.load %arg10[%49, %c0_22] : memref<64x512xf32, #tpu.memory_space<vmem>>, vector<8x512xf32>
    %51 = arith.truncf %44 : vector<8x128xf32> to vector<8x128xbf16>
    %c0_23 = arith.constant 0 : index
    %c0_24 = arith.constant 0 : index
    %52 = vector.load %arg5[%c0_23, %c0_24] : memref<128x512xbf16, #tpu.memory_space<vmem>>, vector<128x512xbf16>
    %cst_25 = arith.constant dense<0.000000e+00> : vector<8x512xf32>
    %53 = tpu.matmul %51, %52, %cst_25 {dimension_numbers = #tpu.dot_dimension_numbers<[1], [0], [0], [1], [0, 0, 1, 1], [], []>} : vector<8x128xbf16>, vector<128x512xbf16>, vector<8x512xf32> -> vector<8x512xf32>
    %54 = arith.addf %50, %53 : vector<8x512xf32>
    %55 = vector.extract_strided_slice %54 {offsets = [0, 0], sizes = [8, 128], strides = [1, 1]} : vector<8x512xf32> to vector<8x128xf32>
    %56 = arith.negf %55 : vector<8x128xf32>
    %57 = math.exp %56 : vector<8x128xf32>
    %cst_26 = arith.constant 1.000000e+00 : f32
    %58 = vector.broadcast %cst_26 : f32 to vector<8x128xf32>
    %59 = arith.addf %58, %57 : vector<8x128xf32>
    %60 = arith.divf %58, %59 : vector<8x128xf32>
    %61 = vector.extract_strided_slice %54 {offsets = [0, 128], sizes = [8, 128], strides = [1, 1]} : vector<8x512xf32> to vector<8x128xf32>
    %62 = arith.negf %61 : vector<8x128xf32>
    %63 = math.exp %62 : vector<8x128xf32>
    %cst_27 = arith.constant 1.000000e+00 : f32
    %64 = vector.broadcast %cst_27 : f32 to vector<8x128xf32>
    %65 = arith.addf %64, %63 : vector<8x128xf32>
    %66 = arith.divf %64, %65 : vector<8x128xf32>
    %67 = vector.extract_strided_slice %54 {offsets = [0, 256], sizes = [8, 128], strides = [1, 1]} : vector<8x512xf32> to vector<8x128xf32>
    %68 = math.tanh %67 : vector<8x128xf32>
    %69 = vector.extract_strided_slice %54 {offsets = [0, 384], sizes = [8, 128], strides = [1, 1]} : vector<8x512xf32> to vector<8x128xf32>
    %70 = arith.negf %69 : vector<8x128xf32>
    %71 = math.exp %70 : vector<8x128xf32>
    %cst_28 = arith.constant 1.000000e+00 : f32
    %72 = vector.broadcast %cst_28 : f32 to vector<8x128xf32>
    %73 = arith.addf %72, %71 : vector<8x128xf32>
    %74 = arith.divf %72, %73 : vector<8x128xf32>
    %75 = arith.mulf %66, %42 : vector<8x128xf32>
    %76 = arith.mulf %60, %68 : vector<8x128xf32>
    %77 = arith.addf %75, %76 : vector<8x128xf32>
    %78 = math.tanh %77 : vector<8x128xf32>
    %79 = arith.mulf %74, %78 : vector<8x128xf32>
    %80 = arith.index_cast %48 : i32 to index
    %c0_29 = arith.constant 0 : index
    %81 = vector.load %arg11[%80, %c0_29] : memref<64x128xf32, #tpu.memory_space<vmem>>, vector<8x128xf32>
    tpu.vector_store %arg11[%80, %c0_29], %79 {strides = array<i32>} : memref<64x128xf32, #tpu.memory_space<vmem>>, vector<8x128xf32>,
    %c2_i32 = arith.constant 2 : i32
    %c8_i32_30 = arith.constant 8 : i32
    %82 = arith.muli %c2_i32, %c8_i32_30 : i32
    %83 = tpu.assume_multiple %82, 8 : i32
    %84 = arith.index_cast %83 : i32 to index
    %c0_31 = arith.constant 0 : index
    %85 = vector.load %arg10[%84, %c0_31] : memref<64x512xf32, #tpu.memory_space<vmem>>, vector<8x512xf32>
    %86 = arith.truncf %79 : vector<8x128xf32> to vector<8x128xbf16>
    %c0_32 = arith.constant 0 : index
    %c0_33 = arith.constant 0 : index
    %87 = vector.load %arg5[%c0_32, %c0_33] : memref<128x512xbf16, #tpu.memory_space<vmem>>, vector<128x512xbf16>
    %cst_34 = arith.constant dense<0.000000e+00> : vector<8x512xf32>
    %88 = tpu.matmul %86, %87, %cst_34 {dimension_numbers = #tpu.dot_dimension_numbers<[1], [0], [0], [1], [0, 0, 1, 1], [], []>} : vector<8x128xbf16>, vector<128x512xbf16>, vector<8x512xf32> -> vector<8x512xf32>
    %89 = arith.addf %85, %88 : vector<8x512xf32>
    %90 = vector.extract_strided_slice %89 {offsets = [0, 0], sizes = [8, 128], strides = [1, 1]} : vector<8x512xf32> to vector<8x128xf32>
    %91 = arith.negf %90 : vector<8x128xf32>
    %92 = math.exp %91 : vector<8x128xf32>
    %cst_35 = arith.constant 1.000000e+00 : f32
    %93 = vector.broadcast %cst_35 : f32 to vector<8x128xf32>
    %94 = arith.addf %93, %92 : vector<8x128xf32>
    %95 = arith.divf %93, %94 : vector<8x128xf32>
    %96 = vector.extract_strided_slice %89 {offsets = [0, 128], sizes = [8, 128], strides = [1, 1]} : vector<8x512xf32> to vector<8x128xf32>
    %97 = arith.negf %96 : vector<8x128xf32>
    %98 = math.exp %97 : vector<8x128xf32>
    %cst_36 = arith.constant 1.000000e+00 : f32
    %99 = vector.broadcast %cst_36 : f32 to vector<8x128xf32>
    %100 = arith.addf %99, %98 : vector<8x128xf32>
    %101 = arith.divf %99, %100 : vector<8x128xf32>
    %102 = vector.extract_strided_slice %89 {offsets = [0, 256], sizes = [8, 128], strides = [1, 1]} : vector<8x512xf32> to vector<8x128xf32>
    %103 = math.tanh %102 : vector<8x128xf32>
    %104 = vector.extract_strided_slice %89 {offsets = [0, 384], sizes = [8, 128], strides = [1, 1]} : vector<8x512xf32> to vector<8x128xf32>
    %105 = arith.negf %104 : vector<8x128xf32>
    %106 = math.exp %105 : vector<8x128xf32>
    %cst_37 = arith.constant 1.000000e+00 : f32
    %107 = vector.broadcast %cst_37 : f32 to vector<8x128xf32>
    %108 = arith.addf %107, %106 : vector<8x128xf32>
    %109 = arith.divf %107, %108 : vector<8x128xf32>
    %110 = arith.mulf %101, %77 : vector<8x128xf32>
    %111 = arith.mulf %95, %103 : vector<8x128xf32>
    %112 = arith.addf %110, %111 : vector<8x128xf32>
    %113 = math.tanh %112 : vector<8x128xf32>
    %114 = arith.mulf %109, %113 : vector<8x128xf32>
    %115 = arith.index_cast %83 : i32 to index
    %c0_38 = arith.constant 0 : index
    %116 = vector.load %arg11[%115, %c0_38] : memref<64x128xf32, #tpu.memory_space<vmem>>, vector<8x128xf32>
    tpu.vector_store %arg11[%115, %c0_38], %114 {strides = array<i32>} : memref<64x128xf32, #tpu.memory_space<vmem>>, vector<8x128xf32>,
    %c3_i32 = arith.constant 3 : i32
    %c8_i32_39 = arith.constant 8 : i32
    %117 = arith.muli %c3_i32, %c8_i32_39 : i32
    %118 = tpu.assume_multiple %117, 8 : i32
    %119 = arith.index_cast %118 : i32 to index
    %c0_40 = arith.constant 0 : index
    %120 = vector.load %arg10[%119, %c0_40] : memref<64x512xf32, #tpu.memory_space<vmem>>, vector<8x512xf32>
    %121 = arith.truncf %114 : vector<8x128xf32> to vector<8x128xbf16>
    %c0_41 = arith.constant 0 : index
    %c0_42 = arith.constant 0 : index
    %122 = vector.load %arg5[%c0_41, %c0_42] : memref<128x512xbf16, #tpu.memory_space<vmem>>, vector<128x512xbf16>
    %cst_43 = arith.constant dense<0.000000e+00> : vector<8x512xf32>
    %123 = tpu.matmul %121, %122, %cst_43 {dimension_numbers = #tpu.dot_dimension_numbers<[1], [0], [0], [1], [0, 0, 1, 1], [], []>} : vector<8x128xbf16>, vector<128x512xbf16>, vector<8x512xf32> -> vector<8x512xf32>
    %124 = arith.addf %120, %123 : vector<8x512xf32>
    %125 = vector.extract_strided_slice %124 {offsets = [0, 0], sizes = [8, 128], strides = [1, 1]} : vector<8x512xf32> to vector<8x128xf32>
    %126 = arith.negf %125 : vector<8x128xf32>
    %127 = math.exp %126 : vector<8x128xf32>
    %cst_44 = arith.constant 1.000000e+00 : f32
    %128 = vector.broadcast %cst_44 : f32 to vector<8x128xf32>
    %129 = arith.addf %128, %127 : vector<8x128xf32>
    %130 = arith.divf %128, %129 : vector<8x128xf32>
    %131 = vector.extract_strided_slice %124 {offsets = [0, 128], sizes = [8, 128], strides = [1, 1]} : vector<8x512xf32> to vector<8x128xf32>
    %132 = arith.negf %131 : vector<8x128xf32>
    %133 = math.exp %132 : vector<8x128xf32>
    %cst_45 = arith.constant 1.000000e+00 : f32
    %134 = vector.broadcast %cst_45 : f32 to vector<8x128xf32>
    %135 = arith.addf %134, %133 : vector<8x128xf32>
    %136 = arith.divf %134, %135 : vector<8x128xf32>
    %137 = vector.extract_strided_slice %124 {offsets = [0, 256], sizes = [8, 128], strides = [1, 1]} : vector<8x512xf32> to vector<8x128xf32>
    %138 = math.tanh %137 : vector<8x128xf32>
    %139 = vector.extract_strided_slice %124 {offsets = [0, 384], sizes = [8, 128], strides = [1, 1]} : vector<8x512xf32> to vector<8x128xf32>
    %140 = arith.negf %139 : vector<8x128xf32>
    %141 = math.exp %140 : vector<8x128xf32>
    %cst_46 = arith.constant 1.000000e+00 : f32
    %142 = vector.broadcast %cst_46 : f32 to vector<8x128xf32>
    %143 = arith.addf %142, %141 : vector<8x128xf32>
    %144 = arith.divf %142, %143 : vector<8x128xf32>
    %145 = arith.mulf %136, %112 : vector<8x128xf32>
    %146 = arith.mulf %130, %138 : vector<8x128xf32>
    %147 = arith.addf %145, %146 : vector<8x128xf32>
    %148 = math.tanh %147 : vector<8x128xf32>
    %149 = arith.mulf %144, %148 : vector<8x128xf32>
    %150 = arith.index_cast %118 : i32 to index
    %c0_47 = arith.constant 0 : index
    %151 = vector.load %arg11[%150, %c0_47] : memref<64x128xf32, #tpu.memory_space<vmem>>, vector<8x128xf32>
    tpu.vector_store %arg11[%150, %c0_47], %149 {strides = array<i32>} : memref<64x128xf32, #tpu.memory_space<vmem>>, vector<8x128xf32>,
    %c4_i32 = arith.constant 4 : i32
    %c8_i32_48 = arith.constant 8 : i32
    %152 = arith.muli %c4_i32, %c8_i32_48 : i32
    %153 = tpu.assume_multiple %152, 8 : i32
    %154 = arith.index_cast %153 : i32 to index
    %c0_49 = arith.constant 0 : index
    %155 = vector.load %arg10[%154, %c0_49] : memref<64x512xf32, #tpu.memory_space<vmem>>, vector<8x512xf32>
    %156 = arith.truncf %149 : vector<8x128xf32> to vector<8x128xbf16>
    %c0_50 = arith.constant 0 : index
    %c0_51 = arith.constant 0 : index
    %157 = vector.load %arg5[%c0_50, %c0_51] : memref<128x512xbf16, #tpu.memory_space<vmem>>, vector<128x512xbf16>
    %cst_52 = arith.constant dense<0.000000e+00> : vector<8x512xf32>
    %158 = tpu.matmul %156, %157, %cst_52 {dimension_numbers = #tpu.dot_dimension_numbers<[1], [0], [0], [1], [0, 0, 1, 1], [], []>} : vector<8x128xbf16>, vector<128x512xbf16>, vector<8x512xf32> -> vector<8x512xf32>
    %159 = arith.addf %155, %158 : vector<8x512xf32>
    %160 = vector.extract_strided_slice %159 {offsets = [0, 0], sizes = [8, 128], strides = [1, 1]} : vector<8x512xf32> to vector<8x128xf32>
    %161 = arith.negf %160 : vector<8x128xf32>
    %162 = math.exp %161 : vector<8x128xf32>
    %cst_53 = arith.constant 1.000000e+00 : f32
    %163 = vector.broadcast %cst_53 : f32 to vector<8x128xf32>
    %164 = arith.addf %163, %162 : vector<8x128xf32>
    %165 = arith.divf %163, %164 : vector<8x128xf32>
    %166 = vector.extract_strided_slice %159 {offsets = [0, 128], sizes = [8, 128], strides = [1, 1]} : vector<8x512xf32> to vector<8x128xf32>
    %167 = arith.negf %166 : vector<8x128xf32>
    %168 = math.exp %167 : vector<8x128xf32>
    %cst_54 = arith.constant 1.000000e+00 : f32
    %169 = vector.broadcast %cst_54 : f32 to vector<8x128xf32>
    %170 = arith.addf %169, %168 : vector<8x128xf32>
    %171 = arith.divf %169, %170 : vector<8x128xf32>
    %172 = vector.extract_strided_slice %159 {offsets = [0, 256], sizes = [8, 128], strides = [1, 1]} : vector<8x512xf32> to vector<8x128xf32>
    %173 = math.tanh %172 : vector<8x128xf32>
    %174 = vector.extract_strided_slice %159 {offsets = [0, 384], sizes = [8, 128], strides = [1, 1]} : vector<8x512xf32> to vector<8x128xf32>
    %175 = arith.negf %174 : vector<8x128xf32>
    %176 = math.exp %175 : vector<8x128xf32>
    %cst_55 = arith.constant 1.000000e+00 : f32
    %177 = vector.broadcast %cst_55 : f32 to vector<8x128xf32>
    %178 = arith.addf %177, %176 : vector<8x128xf32>
    %179 = arith.divf %177, %178 : vector<8x128xf32>
    %180 = arith.mulf %171, %147 : vector<8x128xf32>
    %181 = arith.mulf %165, %173 : vector<8x128xf32>
    %182 = arith.addf %180, %181 : vector<8x128xf32>
    %183 = math.tanh %182 : vector<8x128xf32>
    %184 = arith.mulf %179, %183 : vector<8x128xf32>
    %185 = arith.index_cast %153 : i32 to index
    %c0_56 = arith.constant 0 : index
    %186 = vector.load %arg11[%185, %c0_56] : memref<64x128xf32, #tpu.memory_space<vmem>>, vector<8x128xf32>
    tpu.vector_store %arg11[%185, %c0_56], %184 {strides = array<i32>} : memref<64x128xf32, #tpu.memory_space<vmem>>, vector<8x128xf32>,
    %c5_i32 = arith.constant 5 : i32
    %c8_i32_57 = arith.constant 8 : i32
    %187 = arith.muli %c5_i32, %c8_i32_57 : i32
    %188 = tpu.assume_multiple %187, 8 : i32
    %189 = arith.index_cast %188 : i32 to index
    %c0_58 = arith.constant 0 : index
    %190 = vector.load %arg10[%189, %c0_58] : memref<64x512xf32, #tpu.memory_space<vmem>>, vector<8x512xf32>
    %191 = arith.truncf %184 : vector<8x128xf32> to vector<8x128xbf16>
    %c0_59 = arith.constant 0 : index
    %c0_60 = arith.constant 0 : index
    %192 = vector.load %arg5[%c0_59, %c0_60] : memref<128x512xbf16, #tpu.memory_space<vmem>>, vector<128x512xbf16>
    %cst_61 = arith.constant dense<0.000000e+00> : vector<8x512xf32>
    %193 = tpu.matmul %191, %192, %cst_61 {dimension_numbers = #tpu.dot_dimension_numbers<[1], [0], [0], [1], [0, 0, 1, 1], [], []>} : vector<8x128xbf16>, vector<128x512xbf16>, vector<8x512xf32> -> vector<8x512xf32>
    %194 = arith.addf %190, %193 : vector<8x512xf32>
    %195 = vector.extract_strided_slice %194 {offsets = [0, 0], sizes = [8, 128], strides = [1, 1]} : vector<8x512xf32> to vector<8x128xf32>
    %196 = arith.negf %195 : vector<8x128xf32>
    %197 = math.exp %196 : vector<8x128xf32>
    %cst_62 = arith.constant 1.000000e+00 : f32
    %198 = vector.broadcast %cst_62 : f32 to vector<8x128xf32>
    %199 = arith.addf %198, %197 : vector<8x128xf32>
    %200 = arith.divf %198, %199 : vector<8x128xf32>
    %201 = vector.extract_strided_slice %194 {offsets = [0, 128], sizes = [8, 128], strides = [1, 1]} : vector<8x512xf32> to vector<8x128xf32>
    %202 = arith.negf %201 : vector<8x128xf32>
    %203 = math.exp %202 : vector<8x128xf32>
    %cst_63 = arith.constant 1.000000e+00 : f32
    %204 = vector.broadcast %cst_63 : f32 to vector<8x128xf32>
    %205 = arith.addf %204, %203 : vector<8x128xf32>
    %206 = arith.divf %204, %205 : vector<8x128xf32>
    %207 = vector.extract_strided_slice %194 {offsets = [0, 256], sizes = [8, 128], strides = [1, 1]} : vector<8x512xf32> to vector<8x128xf32>
    %208 = math.tanh %207 : vector<8x128xf32>
    %209 = vector.extract_strided_slice %194 {offsets = [0, 384], sizes = [8, 128], strides = [1, 1]} : vector<8x512xf32> to vector<8x128xf32>
    %210 = arith.negf %209 : vector<8x128xf32>
    %211 = math.exp %210 : vector<8x128xf32>
    %cst_64 = arith.constant 1.000000e+00 : f32
    %212 = vector.broadcast %cst_64 : f32 to vector<8x128xf32>
    %213 = arith.addf %212, %211 : vector<8x128xf32>
    %214 = arith.divf %212, %213 : vector<8x128xf32>
    %215 = arith.mulf %206, %182 : vector<8x128xf32>
    %216 = arith.mulf %200, %208 : vector<8x128xf32>
    %217 = arith.addf %215, %216 : vector<8x128xf32>
    %218 = math.tanh %217 : vector<8x128xf32>
    %219 = arith.mulf %214, %218 : vector<8x128xf32>
    %220 = arith.index_cast %188 : i32 to index
    %c0_65 = arith.constant 0 : index
    %221 = vector.load %arg11[%220, %c0_65] : memref<64x128xf32, #tpu.memory_space<vmem>>, vector<8x128xf32>
    tpu.vector_store %arg11[%220, %c0_65], %219 {strides = array<i32>} : memref<64x128xf32, #tpu.memory_space<vmem>>, vector<8x128xf32>,
    %c6_i32 = arith.constant 6 : i32
    %c8_i32_66 = arith.constant 8 : i32
    %222 = arith.muli %c6_i32, %c8_i32_66 : i32
    %223 = tpu.assume_multiple %222, 8 : i32
    %224 = arith.index_cast %223 : i32 to index
    %c0_67 = arith.constant 0 : index
    %225 = vector.load %arg10[%224, %c0_67] : memref<64x512xf32, #tpu.memory_space<vmem>>, vector<8x512xf32>
    %226 = arith.truncf %219 : vector<8x128xf32> to vector<8x128xbf16>
    %c0_68 = arith.constant 0 : index
    %c0_69 = arith.constant 0 : index
    %227 = vector.load %arg5[%c0_68, %c0_69] : memref<128x512xbf16, #tpu.memory_space<vmem>>, vector<128x512xbf16>
    %cst_70 = arith.constant dense<0.000000e+00> : vector<8x512xf32>
    %228 = tpu.matmul %226, %227, %cst_70 {dimension_numbers = #tpu.dot_dimension_numbers<[1], [0], [0], [1], [0, 0, 1, 1], [], []>} : vector<8x128xbf16>, vector<128x512xbf16>, vector<8x512xf32> -> vector<8x512xf32>
    %229 = arith.addf %225, %228 : vector<8x512xf32>
    %230 = vector.extract_strided_slice %229 {offsets = [0, 0], sizes = [8, 128], strides = [1, 1]} : vector<8x512xf32> to vector<8x128xf32>
    %231 = arith.negf %230 : vector<8x128xf32>
    %232 = math.exp %231 : vector<8x128xf32>
    %cst_71 = arith.constant 1.000000e+00 : f32
    %233 = vector.broadcast %cst_71 : f32 to vector<8x128xf32>
    %234 = arith.addf %233, %232 : vector<8x128xf32>
    %235 = arith.divf %233, %234 : vector<8x128xf32>
    %236 = vector.extract_strided_slice %229 {offsets = [0, 128], sizes = [8, 128], strides = [1, 1]} : vector<8x512xf32> to vector<8x128xf32>
    %237 = arith.negf %236 : vector<8x128xf32>
    %238 = math.exp %237 : vector<8x128xf32>
    %cst_72 = arith.constant 1.000000e+00 : f32
    %239 = vector.broadcast %cst_72 : f32 to vector<8x128xf32>
    %240 = arith.addf %239, %238 : vector<8x128xf32>
    %241 = arith.divf %239, %240 : vector<8x128xf32>
    %242 = vector.extract_strided_slice %229 {offsets = [0, 256], sizes = [8, 128], strides = [1, 1]} : vector<8x512xf32> to vector<8x128xf32>
    %243 = math.tanh %242 : vector<8x128xf32>
    %244 = vector.extract_strided_slice %229 {offsets = [0, 384], sizes = [8, 128], strides = [1, 1]} : vector<8x512xf32> to vector<8x128xf32>
    %245 = arith.negf %244 : vector<8x128xf32>
    %246 = math.exp %245 : vector<8x128xf32>
    %cst_73 = arith.constant 1.000000e+00 : f32
    %247 = vector.broadcast %cst_73 : f32 to vector<8x128xf32>
    %248 = arith.addf %247, %246 : vector<8x128xf32>
    %249 = arith.divf %247, %248 : vector<8x128xf32>
    %250 = arith.mulf %241, %217 : vector<8x128xf32>
    %251 = arith.mulf %235, %243 : vector<8x128xf32>
    %252 = arith.addf %250, %251 : vector<8x128xf32>
    %253 = math.tanh %252 : vector<8x128xf32>
    %254 = arith.mulf %249, %253 : vector<8x128xf32>
    %255 = arith.index_cast %223 : i32 to index
    %c0_74 = arith.constant 0 : index
    %256 = vector.load %arg11[%255, %c0_74] : memref<64x128xf32, #tpu.memory_space<vmem>>, vector<8x128xf32>
    tpu.vector_store %arg11[%255, %c0_74], %254 {strides = array<i32>} : memref<64x128xf32, #tpu.memory_space<vmem>>, vector<8x128xf32>,
    %c7_i32 = arith.constant 7 : i32
    %c8_i32_75 = arith.constant 8 : i32
    %257 = arith.muli %c7_i32, %c8_i32_75 : i32
    %258 = tpu.assume_multiple %257, 8 : i32
    %259 = arith.index_cast %258 : i32 to index
    %c0_76 = arith.constant 0 : index
    %260 = vector.load %arg10[%259, %c0_76] : memref<64x512xf32, #tpu.memory_space<vmem>>, vector<8x512xf32>
    %261 = arith.truncf %254 : vector<8x128xf32> to vector<8x128xbf16>
    %c0_77 = arith.constant 0 : index
    %c0_78 = arith.constant 0 : index
    %262 = vector.load %arg5[%c0_77, %c0_78] : memref<128x512xbf16, #tpu.memory_space<vmem>>, vector<128x512xbf16>
    %cst_79 = arith.constant dense<0.000000e+00> : vector<8x512xf32>
    %263 = tpu.matmul %261, %262, %cst_79 {dimension_numbers = #tpu.dot_dimension_numbers<[1], [0], [0], [1], [0, 0, 1, 1], [], []>} : vector<8x128xbf16>, vector<128x512xbf16>, vector<8x512xf32> -> vector<8x512xf32>
    %264 = arith.addf %260, %263 : vector<8x512xf32>
    %265 = vector.extract_strided_slice %264 {offsets = [0, 0], sizes = [8, 128], strides = [1, 1]} : vector<8x512xf32> to vector<8x128xf32>
    %266 = arith.negf %265 : vector<8x128xf32>
    %267 = math.exp %266 : vector<8x128xf32>
    %cst_80 = arith.constant 1.000000e+00 : f32
    %268 = vector.broadcast %cst_80 : f32 to vector<8x128xf32>
    %269 = arith.addf %268, %267 : vector<8x128xf32>
    %270 = arith.divf %268, %269 : vector<8x128xf32>
    %271 = vector.extract_strided_slice %264 {offsets = [0, 128], sizes = [8, 128], strides = [1, 1]} : vector<8x512xf32> to vector<8x128xf32>
    %272 = arith.negf %271 : vector<8x128xf32>
    %273 = math.exp %272 : vector<8x128xf32>
    %cst_81 = arith.constant 1.000000e+00 : f32
    %274 = vector.broadcast %cst_81 : f32 to vector<8x128xf32>
    %275 = arith.addf %274, %273 : vector<8x128xf32>
    %276 = arith.divf %274, %275 : vector<8x128xf32>
    %277 = vector.extract_strided_slice %264 {offsets = [0, 256], sizes = [8, 128], strides = [1, 1]} : vector<8x512xf32> to vector<8x128xf32>
    %278 = math.tanh %277 : vector<8x128xf32>
    %279 = vector.extract_strided_slice %264 {offsets = [0, 384], sizes = [8, 128], strides = [1, 1]} : vector<8x512xf32> to vector<8x128xf32>
    %280 = arith.negf %279 : vector<8x128xf32>
    %281 = math.exp %280 : vector<8x128xf32>
    %cst_82 = arith.constant 1.000000e+00 : f32
    %282 = vector.broadcast %cst_82 : f32 to vector<8x128xf32>
    %283 = arith.addf %282, %281 : vector<8x128xf32>
    %284 = arith.divf %282, %283 : vector<8x128xf32>
    %285 = arith.mulf %276, %252 : vector<8x128xf32>
    %286 = arith.mulf %270, %278 : vector<8x128xf32>
    %287 = arith.addf %285, %286 : vector<8x128xf32>
    %288 = math.tanh %287 : vector<8x128xf32>
    %289 = arith.mulf %284, %288 : vector<8x128xf32>
    %290 = arith.index_cast %258 : i32 to index
    %c0_83 = arith.constant 0 : index
    %291 = vector.load %arg11[%290, %c0_83] : memref<64x128xf32, #tpu.memory_space<vmem>>, vector<8x128xf32>
    tpu.vector_store %arg11[%290, %c0_83], %289 {strides = array<i32>} : memref<64x128xf32, #tpu.memory_space<vmem>>, vector<8x128xf32>,
    %c8_i32_84 = arith.constant 8 : i32
    %c0_85 = arith.constant 0 : index
    %c0_86 = arith.constant 0 : index
    %292 = vector.load %arg12[%c0_85, %c0_86] : memref<8x128xf32, #tpu.memory_space<vmem>>, vector<8x128xf32>
    tpu.vector_store %arg12[%c0_85, %c0_86], %289 {strides = array<i32>} : memref<8x128xf32, #tpu.memory_space<vmem>>, vector<8x128xf32>,
    %c0_87 = arith.constant 0 : index
    %c0_88 = arith.constant 0 : index
    %293 = vector.load %arg13[%c0_87, %c0_88] : memref<8x128xf32, #tpu.memory_space<vmem>>, vector<8x128xf32>
    tpu.vector_store %arg13[%c0_87, %c0_88], %287 {strides = array<i32>} : memref<8x128xf32, #tpu.memory_space<vmem>>, vector<8x128xf32>,
    %c0_89 = arith.constant 0 : index
    %c0_90 = arith.constant 0 : index
    %294 = vector.load %arg11[%c0_89, %c0_90] : memref<64x128xf32, #tpu.memory_space<vmem>>, vector<64x128xf32>
    %295 = arith.truncf %294 : vector<64x128xf32> to vector<64x128xbf16>
    %c0_91 = arith.constant 0 : index
    %c0_92 = arith.constant 0 : index
    %296 = vector.load %arg7[%c0_91, %c0_92] : memref<64x128xbf16, #tpu.memory_space<vmem>>, vector<64x128xbf16>
    tpu.vector_store %arg7[%c0_91, %c0_92], %295 {strides = array<i32>} : memref<64x128xbf16, #tpu.memory_space<vmem>>, vector<64x128xbf16>,
    %c0_i32_93 = arith.constant 0 : i32
    %297 = arith.cmpi eq, %arg0, %c0_i32_93 : i32
    %298 = arith.extui %297 : i1 to i32
    %c0_i32_94 = arith.constant 0 : i32
    %299 = arith.cmpi ne, %298, %c0_i32_94 : i32
    scf.if %299 {
      %c0_95 = arith.constant 0 : index
      %c0_96 = arith.constant 0 : index
      %300 = vector.load %arg8[%c0_95, %c0_96] : memref<8x128xf32, #tpu.memory_space<vmem>>, vector<8x128xf32>
      tpu.vector_store %arg8[%c0_95, %c0_96], %289 {strides = array<i32>} : memref<8x128xf32, #tpu.memory_space<vmem>>, vector<8x128xf32>,
      %c0_97 = arith.constant 0 : index
      %c0_98 = arith.constant 0 : index
      %301 = vector.load %arg9[%c0_97, %c0_98] : memref<8x128xf32, #tpu.memory_space<vmem>>, vector<8x128xf32>
      tpu.vector_store %arg9[%c0_97, %c0_98], %287 {strides = array<i32>} : memref<8x128xf32, #tpu.memory_space<vmem>>, vector<8x128xf32>,
    } else {
    }
    return
  }
  func.func @transform_0(%arg0: i32) -> (i32, i32) {
    %c0_i32 = arith.constant 0 : i32
    %c0_i32_0 = arith.constant 0 : i32
    return %arg0, %c0_i32 : i32, i32
  }
  func.func @transform_1(%arg0: i32) -> (i32, i32) {
    %c0_i32 = arith.constant 0 : i32
    %c0_i32_0 = arith.constant 0 : i32
    %c0_i32_1 = arith.constant 0 : i32
    return %c0_i32, %c0_i32_0 : i32, i32
  }
  func.func @transform_2(%arg0: i32) -> (i32, i32) {
    %c0_i32 = arith.constant 0 : i32
    %c0_i32_0 = arith.constant 0 : i32
    %c0_i32_1 = arith.constant 0 : i32
    return %c0_i32, %c0_i32_0 : i32, i32
  }
  func.func @transform_3(%arg0: i32) -> (i32, i32) {
    %c0_i32 = arith.constant 0 : i32
    %c0_i32_0 = arith.constant 0 : i32
    %c0_i32_1 = arith.constant 0 : i32
    return %c0_i32, %c0_i32_0 : i32, i32
  }
  func.func @transform_4(%arg0: i32) -> (i32, i32) {
    %c0_i32 = arith.constant 0 : i32
    %c0_i32_0 = arith.constant 0 : i32
    %c0_i32_1 = arith.constant 0 : i32
    return %c0_i32, %c0_i32_0 : i32, i32
  }
  func.func @transform_5(%arg0: i32) -> (i32, i32) {
    %c0_i32 = arith.constant 0 : i32
    %c0_i32_0 = arith.constant 0 : i32
    %c0_i32_1 = arith.constant 0 : i32
    return %c0_i32, %c0_i32_0 : i32, i32
  }
  func.func @transform_6(%arg0: i32) -> (i32, i32) {
    %c0_i32 = arith.constant 0 : i32
    %c0_i32_0 = arith.constant 0 : i32
    return %arg0, %c0_i32 : i32, i32
  }
  func.func @transform_7(%arg0: i32) -> (i32, i32) {
    %c0_i32 = arith.constant 0 : i32
    %c0_i32_0 = arith.constant 0 : i32
    %c0_i32_1 = arith.constant 0 : i32
    return %c0_i32, %c0_i32_0 : i32, i32
  }
  func.func @transform_8(%arg0: i32) -> (i32, i32) {
    %c0_i32 = arith.constant 0 : i32
    %c0_i32_0 = arith.constant 0 : i32
    %c0_i32_1 = arith.constant 0 : i32
    return %c0_i32, %c0_i32_0 : i32, i32
  }
}

</mosaic_0001>

<bundles_post_ra>
// kernel: tpu_custom_call.1
= control target key start
LH: loop header
LB: loop body
LE: loop exit
PB: predicated region body
PF: predicated region fallthrough
CT: control target
= control target key end

     0   :  { %14 = vsyncpa [#allocation7], 0  ;;  %s4385_s0 = inlined_call_operand.vmem [shape: bf16[64,32], index: 0, kind: input, shape index: {}]   ;;  %s4386_s1 = inlined_call_operand.vmem [shape: f32[8,128], index: 1, kind: input, shape index: {}]   ;;  %s4387_s2 = inlined_call_operand.vmem [shape: f32[8,128], index: 2, kind: input, shape index: {}]   ;;  %s4388_s3 = inlined_call_operand.hbm [shape: bf16[32,512], index: 3, kind: input, shape index: {}]   ;;  %s4389_s4 = inlined_call_operand.hbm [shape: bf16[128,512], index: 4, kind: input, shape index: {}]   ;;  %s4390_s5 = inlined_call_operand.vmem [shape: f32[1,512], index: 5, kind: input, shape index: {}]   ;;  %s4391_s6 = inlined_call_operand.hbm [shape: bf16[64,128], index: 6, kind: output, shape index: {0}]   ;;  %s4392_s7 = inlined_call_operand.hbm [shape: f32[8,128], index: 7, kind: output, shape index: {1}]   ;;  %s4393_s8 = inlined_call_operand.hbm [shape: f32[8,128], index: 8, kind: output, shape index: {2}]  }
   0x1   :  { %15 = vsyncpa [#allocation10], 0 }
   0x2   :  { %16 = vsyncpa [#allocation8], 0 }
   0x3   :  { %17 = vsyncpa [#allocation13], 0  ;;  %s3665_s27 = smov [#allocation6]   ;;  %s3547_s9 = scalar_lea.hbm %s4388_s3, 1024 }
   0x4   :  { %s29_s28 = sshll.u32 %s3665_s27, 4  ;;  %p3548_p0 = scmp.ne.s32.totalorder %s4388_s3, %s3547_s9  ;;  %s30_s28 = int_to_ptr.vmem [resolvable:$true] %s29_s28 }
   0x5   :  { %p3551_p1 = scmp.lt.u32.totalorder %s3547_s9, %s4388_s3 }
   0x7   :  { %p3553_p2 = pnand %p3551_p1, %p3548_p0 }
   0x9   :  { %3556 = shalt.err (!%p3553_p2)
}
   0xa   :  { %s3557_s14 = scalar_lea.vmem %s30_s28, 1024  ;;  %p3562_p4 = scmp.lt.s32.totalorder %s30_s28, %s30_s28 }
   0xb   :  { %p3558_p3 = scmp.ne.s32.totalorder %s30_s28, %s3557_s14  ;;  %p3563_p5 = scmp.lt.s32.totalorder %s3557_s14, %s3557_s14 }
   0xd   :  { %p3564_p6 = por %p3563_p5, %p3562_p4 }
   0xf   :  { %p3565_p7 = pnand %p3564_p6, %p3558_p3 }
  0x11   :  { %3568 = shalt.err (!%p3565_p7)
}
  0x12   :  { %s3666_s15 = smov 256   ;;  %s3667_s16 = smov 16  }
  0x13   :  { %35 = dma.hbm_to_vmem [thread:$0]  %s4388_s3, 1024, %s30_s28, [#allocation7], %s3666_s15, %s3666_s15, %s3667_s16  }
  0x14   :  { %s3668_s19 = smov [#allocation9]   ;;  %s3569_s23 = scalar_lea.hbm %s4389_s4, 4096 }
  0x15   :  { %s41_s20 = sshll.u32 %s3668_s19, 4  ;;  %p3570_p8 = scmp.ne.s32.totalorder %s4389_s4, %s3569_s23  ;;  %s42_s20 = int_to_ptr.vmem [resolvable:$true] %s41_s20 }
  0x16   :  { %p3573_p9 = scmp.lt.u32.totalorder %s3569_s23, %s4389_s4 }
  0x18   :  { %p3575_p10 = pnand %p3573_p9, %p3570_p8 }
  0x1a   :  { %3578 = shalt.err (!%p3575_p10)
}
  0x1b   :  { %s3579_s29 = scalar_lea.vmem %s42_s20, 4096  ;;  %p3584_p12 = scmp.lt.s32.totalorder %s42_s20, %s42_s20 }
  0x1c   :  { %p3580_p11 = scmp.ne.s32.totalorder %s42_s20, %s3579_s29  ;;  %p3585_p13 = scmp.lt.s32.totalorder %s3579_s29, %s3579_s29 }
  0x1e   :  { %p3586_p0 = por %p3585_p13, %p3584_p12 }
  0x20   :  { %p3587_p1 = pnand %p3586_p0, %p3580_p11 }
  0x22   :  { %3590 = shalt.err (!%p3587_p1)
}
  0x23   :  { %47 = dma.hbm_to_vmem [thread:$0]  %s4389_s4, 4096, %s42_s20, [#allocation10], %s3666_s15, %s3666_s15, %s3667_s16  }
  0x24   :  { %3657 = dma.done.wait [#allocation7], 1024  }
  0x25   :  { %3658 = vsyncadd [#allocation7], 4294966272 }
  0x26   :  { %3659 = dma.done.wait [#allocation10], 4096  }
  0x27   :  { %3660 = vsyncadd [#allocation10], 4294963200  ;;  %v4394_v0 = vmov 0   ;;  %v3307_v1 = vld [vmem:[#allocation6 + $0x4] ss:$16 sps:$4 sm:$0xff]   ;;  %vm163_vm0 = vcmask 261120   ;;  %v83_v47 = vlaneseq }
  0x28   :  { %208 = vmatprep.mubr.bf16.mxu0 %v4394_v0  ;;  %281 = vmatprep.mubr.bf16.mxu1 %v4394_v0  ;;  %v3309_v2 = vld [vmem:[#allocation6 + $0xc] ss:$16 sps:$4 sm:$0xff]   ;;  %v3311_v3 = vld [vmem:[#allocation6] ss:$16 sps:$4 sm:$0xff]   ;;  %v3312_v4 = vld [vmem:[#allocation6 + $0x8] ss:$16 sps:$4 sm:$0xff]  }
  0x29   :  { %176 = vmatprep.subr.bf16.mxu0 %v3307_v1  ;;  %249 = vmatprep.subr.bf16.mxu1 %v3309_v2  ;;  %v3313_v5 = vld [vmem:[#allocation6 + $0x24] ss:$16 sps:$4 sm:$0xff]   ;;  %v3315_v6 = vld [vmem:[#allocation6 + $0x2c] ss:$16 sps:$4 sm:$0xff]   ;;  %v3317_v7 = vld [vmem:[#allocation6 + $0x20] ss:$16 sps:$4 sm:$0xff]  }
  0x2a   :  { %177 = vmatpush1.bf16.msra.mxu0 %v3311_v3  ;;  %250 = vmatpush1.bf16.msra.mxu1 %v3312_v4  ;;  %v3318_v8 = vld [vmem:[#allocation6 + $0x28] ss:$16 sps:$4 sm:$0xff]   ;;  %v3319_v9 = vld [vmem:[%s4385_s0] sm:$0xff]   ;;  %v3755_v13 = vld [vmem:[#allocation9 + $0xc] ss:$16 sps:$4 sm:$0xff]   ;;  %v84_v48 = vshrl.u32 %v83_v47, 7 }
  0x2b   :  { %178 = vmatprep.subr.bf16.mxu0 %v3313_v5  ;;  %251 = vmatprep.subr.bf16.mxu1 %v3315_v6  ;;  %v3749_v10 = vld [vmem:[#allocation9] ss:$16 sps:$4 sm:$0xff]   ;;  %v3751_v11 = vld [vmem:[#allocation9 + $0x4] ss:$16 sps:$4 sm:$0xff]   ;;  %v3753_v12 = vld [vmem:[#allocation9 + $0x8] ss:$16 sps:$4 sm:$0xff]  }
  0x2c   :  { %v3759_v14 = vld [vmem:[#allocation9 + $0x24] ss:$16 sps:$4 sm:$0xff]   ;;  %v3763_v15 = vld [vmem:[#allocation9 + $0x20] ss:$16 sps:$4 sm:$0xff]   ;;  %v3765_v16 = vld [vmem:[#allocation9 + $0x2c] ss:$16 sps:$4 sm:$0xff]  }
  0x2d   :  { %v3769_v17 = vld [vmem:[#allocation9 + $0x28] ss:$16 sps:$4 sm:$0xff]   ;;  %v3773_v18 = vld [vmem:[#allocation9 + $0x44] ss:$16 sps:$4 sm:$0xff]   ;;  %v3780_v20 = vld [vmem:[#allocation9 + $0x4c] ss:$16 sps:$4 sm:$0xff]  }
  0x2e   :  { %179 = vmatpush1.bf16.msra.mxu0 %v3317_v7  ;;  %252 = vmatpush1.bf16.msra.mxu1 %v3318_v8  ;;  %v3332_v19 = vld [vmem:[%s4385_s0 + $0x8] sm:$0xff]   ;;  %v3784_v21 = vld [vmem:[#allocation9 + $0x40] ss:$16 sps:$4 sm:$0xff]   ;;  %v3790_v23 = vld [vmem:[#allocation9 + $0x64] ss:$16 sps:$4 sm:$0xff]   ;;  %v93_v49 = vsub.s32 2, %v84_v48 }
  0x2f   :  { %556 = vmatprep.subr.bf16.mxu0 %v3751_v11  ;;  %597 = vmatprep.subr.bf16.mxu1 %v3755_v13  ;;  %v3786_v22 = vld [vmem:[#allocation9 + $0x48] ss:$16 sps:$4 sm:$0xff]   ;;  %v3792_v24 = vld [vmem:[#allocation9 + $0x6c] ss:$16 sps:$4 sm:$0xff]   ;;  %v3796_v25 = vld [vmem:[#allocation9 + $0x60] ss:$16 sps:$4 sm:$0xff]  }
  0x30   :  { %v3800_v26 = vld [vmem:[#allocation9 + $0x68] ss:$16 sps:$4 sm:$0xff]   ;;  %v3804_v27 = vld [vmem:[#allocation9 + $0x84] ss:$16 sps:$4 sm:$0xff]   ;;  %v3806_v28 = vld [vmem:[#allocation9 + $0x8c] ss:$16 sps:$4 sm:$0xff]  }
  0x31   :  { %2970 = vmatmul.mubr.msk.bf16.vlgmr.msra.gmra.mrb[0].mxu0 %vm163_vm0, %v3319_v9  ;;  %2974 = vmatmul.mubr.msk.bf16.vlgmr.msra.gmra.mrb[0].mxu1 %vm163_vm0, %v3319_v9  ;;  %v3345_v29 = vld [vmem:[%s4385_s0 + $0x10] sm:$0xff]   ;;  %v3815_v31 = vld [vmem:[#allocation9 + $0x88] ss:$16 sps:$4 sm:$0xff]   ;;  %v3823_v33 = vld [vmem:[#allocation9 + $0xac] ss:$16 sps:$4 sm:$0xff]   ;;  %v97_v50 = vsub.s32 3, %v84_v48 }
  0x32   :  { %557 = vmatpush1.bf16.msra.mxu0 %v3749_v10  ;;  %598 = vmatpush1.bf16.msra.mxu1 %v3753_v12  ;;  %v3813_v30 = vld [vmem:[#allocation9 + $0x80] ss:$16 sps:$4 sm:$0xff]   ;;  %v3819_v32 = vld [vmem:[#allocation9 + $0xa4] ss:$16 sps:$4 sm:$0xff]   ;;  %v3829_v35 = vld [vmem:[#allocation9 + $0xa8] ss:$16 sps:$4 sm:$0xff]  }
  0x33   :  { %558 = vmatprep.subr.bf16.mxu0 %v3759_v14  ;;  %599 = vmatprep.subr.bf16.mxu1 %v3765_v16  ;;  %v3827_v34 = vld [vmem:[#allocation9 + $0xa0] ss:$16 sps:$4 sm:$0xff]   ;;  %v3833_v36 = vld [vmem:[#allocation9 + $0xc4] ss:$16 sps:$4 sm:$0xff]   ;;  %v3837_v37 = vld [vmem:[#allocation9 + $0xcc] ss:$16 sps:$4 sm:$0xff]  }
  0x34   :  { %218 = vmatprep.mubr.bf16.mxu0 %v4394_v0  ;;  %291 = vmatprep.mubr.bf16.mxu1 %v4394_v0  ;;  %v3358_v38 = vld [vmem:[%s4385_s0 + $0x18] sm:$0xff]   ;;  %v3844_v39 = vld [vmem:[#allocation9 + $0xc0] ss:$16 sps:$4 sm:$0xff]   ;;  %v3848_v41 = vld [vmem:[#allocation9 + $0xe4] ss:$16 sps:$4 sm:$0xff]   ;;  %v85_v51 = vsub.s32 0, %v84_v48 }
  0x35   :  { %v3846_v40 = vld [vmem:[#allocation9 + $0xc8] ss:$16 sps:$4 sm:$0xff]   ;;  %v3850_v42 = vld [vmem:[#allocation9 + $0xec] ss:$16 sps:$4 sm:$0xff]   ;;  %v3856_v43 = vld [vmem:[#allocation9 + $0xe0] ss:$16 sps:$4 sm:$0xff]  }
  0x36   :  { %559 = vmatpush1.bf16.msra.mxu0 %v3763_v15  ;;  %600 = vmatpush1.bf16.msra.mxu1 %v3769_v17  ;;  %v3858_v44 = vld [vmem:[#allocation9 + $0xe8] ss:$16 sps:$4 sm:$0xff]   ;;  %v61_v45 = vld [vmem:[%s4386_s1] sm:$0xff]  ;;  %v89_v53 = vsub.s32 1, %v84_v48  ;;  %s3671_s19 = smov [#allocation11]   ;;  %s3672_s21 = smov [#allocation14]  }
  0x37   :  { %560 = vmatprep.subr.bf16.mxu0 %v3773_v18  ;;  %601 = vmatprep.subr.bf16.mxu1 %v3780_v20  ;;  %v363_v46 = vpack.c.bf16 %v61_v45, %v61_v45  ;;  %v81_v52 = vld [vmem:[%s4390_s5] sm:$0xf]  ;;  %s2911_s20 = sshll.u32 %s3671_s19, 4  ;;  %s2934_s22 = sshll.u32 %s3672_s21, 4  ;;  %s4334_s20 = int_to_ptr.vmem [resolvable:$true] %s2911_s20  ;;  %s4336_s22 = int_to_ptr.vmem [resolvable:$true] %s2934_s22 }
  0x38   :  { %v3912_v54 = vrot.slane %v81_v52, %v93_v49  ;;  %v3918_v57 = vrot.slane %v81_v52, %v97_v50  ;;  %v86_v58 = vrot.slane %v81_v52, %v85_v51  ;;  %v90_v61 = vrot.slane %v81_v52, %v89_v53 }
  0x39   :  { %2971 = vmatmul.mubr.msk.bf16.gmra.mrb[4].mxu0 %vm163_vm0, %v3332_v19  ;;  %2975 = vmatmul.mubr.msk.bf16.gmra.mrb[4].mxu1 %vm163_vm0, %v3332_v19 }
  0x3a   :  { %561 = vmatpush1.bf16.msra.mxu0 %v3784_v21  ;;  %602 = vmatpush1.bf16.msra.mxu1 %v3786_v22 }
  0x3b   :  { %562 = vmatprep.subr.bf16.mxu0 %v3790_v23  ;;  %603 = vmatprep.subr.bf16.mxu1 %v3792_v24 }
  0x3c   :  { %228 = vmatprep.mubr.bf16.mxu0 %v4394_v0  ;;  %301 = vmatprep.mubr.bf16.mxu1 %v4394_v0 }
  0x3e   :  { %563 = vmatpush1.bf16.msra.mxu0 %v3796_v25  ;;  %604 = vmatpush1.bf16.msra.mxu1 %v3800_v26 }
  0x3f   :  { %564 = vmatprep.subr.bf16.mxu0 %v3804_v27  ;;  %605 = vmatprep.subr.bf16.mxu1 %v3806_v28 }
  0x41   :  { %2972 = vmatmul.mubr.msk.bf16.gmra.mrb[8].mxu0 %vm163_vm0, %v3345_v29  ;;  %2976 = vmatmul.mubr.msk.bf16.gmra.mrb[8].mxu1 %vm163_vm0, %v3345_v29 }
  0x42   :  { %565 = vmatpush1.bf16.msra.mxu0 %v3813_v30  ;;  %606 = vmatpush1.bf16.msra.mxu1 %v3815_v31 }
  0x43   :  { %566 = vmatprep.subr.bf16.mxu0 %v3819_v32  ;;  %607 = vmatprep.subr.bf16.mxu1 %v3823_v33 }
  0x44   :  { %238 = vmatprep.mubr.bf16.mxu0 %v4394_v0  ;;  %311 = vmatprep.mubr.bf16.mxu1 %v4394_v0 }
  0x46   :  { %567 = vmatpush1.bf16.msra.mxu0 %v3827_v34  ;;  %608 = vmatpush1.bf16.msra.mxu1 %v3829_v35 }
  0x47   :  { %568 = vmatprep.subr.bf16.mxu0 %v3833_v36  ;;  %609 = vmatprep.subr.bf16.mxu1 %v3837_v37 }
  0x49   :  { %2973 = vmatmul.mubr.msk.bf16.gmra.mrb[12].mxu0 %vm163_vm0, %v3358_v38  ;;  %2977 = vmatmul.mubr.msk.bf16.gmra.mrb[12].mxu1 %vm163_vm0, %v3358_v38 }
  0x4a   :  { %569 = vmatpush1.bf16.msra.mxu0 %v3844_v39  ;;  %610 = vmatpush1.bf16.msra.mxu1 %v3846_v40 }
  0x4b   :  { %570 = vmatprep.subr.bf16.mxu0 %v3848_v41  ;;  %611 = vmatprep.subr.bf16.mxu1 %v3850_v42 }
  0x4c   :  { %588 = vmatprep.mubr.bf16.mxu0 %v4394_v0  ;;  %629 = vmatprep.mubr.bf16.mxu1 %v4394_v0 }
  0x4e   :  { %571 = vmatpush1.bf16.msra.mxu0 %v3856_v43  ;;  %612 = vmatpush1.bf16.msra.mxu1 %v3858_v44 }
  0x4f   :  { %867 = vmatprep.subr.bf16.mxu0 %v3751_v11  ;;  %908 = vmatprep.subr.bf16.mxu1 %v3755_v13 }
  0x51   :  { %589 = vmatmul.mubr.bf16.vlgmr.msra.gmra.mrb[16].mxu0 %v363_v46  ;;  %630 = vmatmul.mubr.bf16.vlgmr.msra.gmra.mrb[16].mxu1 %v363_v46 }
  0x52   :  { %868 = vmatpush1.bf16.msra.mxu0 %v3749_v10  ;;  %909 = vmatpush1.bf16.msra.mxu1 %v3753_v12 }
  0x53   :  { %869 = vmatprep.subr.bf16.mxu0 %v3759_v14  ;;  %910 = vmatprep.subr.bf16.mxu1 %v3765_v16 }
  0x54   :  { %899 = vmatprep.mubr.bf16.mxu0 %v4394_v0  ;;  %940 = vmatprep.mubr.bf16.mxu1 %v4394_v0 }
  0x56   :  { %870 = vmatpush1.bf16.msra.mxu0 %v3763_v15  ;;  %911 = vmatpush1.bf16.msra.mxu1 %v3769_v17 }
  0x57   :  { %871 = vmatprep.subr.bf16.mxu0 %v3773_v18  ;;  %912 = vmatprep.subr.bf16.mxu1 %v3780_v20 }
  0x5a   :  { %872 = vmatpush1.bf16.msra.mxu0 %v3784_v21  ;;  %913 = vmatpush1.bf16.msra.mxu1 %v3786_v22 }
  0x5b   :  { %873 = vmatprep.subr.bf16.mxu0 %v3790_v23  ;;  %914 = vmatprep.subr.bf16.mxu1 %v3792_v24 }
  0x5e   :  { %874 = vmatpush1.bf16.msra.mxu0 %v3796_v25  ;;  %915 = vmatpush1.bf16.msra.mxu1 %v3800_v26 }
  0x5f   :  { %875 = vmatprep.subr.bf16.mxu0 %v3804_v27  ;;  %916 = vmatprep.subr.bf16.mxu1 %v3806_v28 }
  0x62   :  { %876 = vmatpush1.bf16.msra.mxu0 %v3813_v30  ;;  %917 = vmatpush1.bf16.msra.mxu1 %v3815_v31 }
  0x63   :  { %877 = vmatprep.subr.bf16.mxu0 %v3819_v32  ;;  %918 = vmatprep.subr.bf16.mxu1 %v3823_v33 }
  0x66   :  { %878 = vmatpush1.bf16.msra.mxu0 %v3827_v34  ;;  %919 = vmatpush1.bf16.msra.mxu1 %v3829_v35 }
  0x67   :  { %879 = vmatprep.subr.bf16.mxu0 %v3833_v36  ;;  %920 = vmatprep.subr.bf16.mxu1 %v3837_v37 }
  0x6a   :  { %880 = vmatpush1.bf16.msra.mxu0 %v3844_v39  ;;  %921 = vmatpush1.bf16.msra.mxu1 %v3846_v40 }
  0x6b   :  { %881 = vmatprep.subr.bf16.mxu0 %v3848_v41  ;;  %922 = vmatprep.subr.bf16.mxu1 %v3850_v42 }
  0x6e   :  { %882 = vmatpush1.bf16.msra.mxu0 %v3856_v43  ;;  %923 = vmatpush1.bf16.msra.mxu1 %v3858_v44 }
  0x6f   :  { %1179 = vmatprep.subr.bf16.mxu0 %v3751_v11  ;;  %1220 = vmatprep.subr.bf16.mxu1 %v3755_v13 }
 0x104   :  { %v3914_v55 = vpop.f32.mrb[0].mxu0  ;;  %v3916_v56 = vpop.f32.mrb[0].mxu1 }
 0x105   :  { %v212_v59 = vpop.f32.mrb[1].mxu0  ;;  %v285_v60 = vpop.f32.mrb[1].mxu1 }
 0x106   :  { %v214_v62 = vpop.f32.mrb[2].mxu0  ;;  %v287_v63 = vpop.f32.mrb[2].mxu1 }
 0x107   :  { %v3920_v1 = vadd.f32 %v214_v62, %v86_v58  ;;  %v216_v2 = vpop.f32.mrb[3].mxu0  ;;  %v3923_v3 = vadd.f32 %v287_v63, %v3912_v54  ;;  %v289_v4 = vpop.f32.mrb[3].mxu1 }
 0x108   :  { %v3925_v5 = vadd.f32 %v216_v2, %v90_v61  ;;  %v3928_v6 = vadd.f32 %v289_v4, %v3918_v57 }
 0x10c   :  { %v220_v7 = vpop.f32.mrb[4].mxu0  ;;  %v293_v8 = vpop.f32.mrb[4].mxu1 }
 0x10d   :  { %v3930_v9 = vadd.f32 %v220_v7, %v86_v58  ;;  %v222_v19 = vpop.f32.mrb[5].mxu0  ;;  %v3933_v29 = vadd.f32 %v293_v8, %v3912_v54  ;;  %v295_v38 = vpop.f32.mrb[5].mxu1 }
 0x10e   :  { %v3935_v45 = vadd.f32 %v222_v19, %v90_v61  ;;  %v224_v46 = vpop.f32.mrb[6].mxu0  ;;  %v3938_v47 = vadd.f32 %v295_v38, %v3918_v57  ;;  %v297_v48 = vpop.f32.mrb[6].mxu1 }
 0x10f   :  { %v3940_v49 = vadd.f32 %v224_v46, %v86_v58  ;;  %v226_v50 = vpop.f32.mrb[7].mxu0  ;;  %v3943_v51 = vadd.f32 %v297_v48, %v3912_v54  ;;  %v299_v52 = vpop.f32.mrb[7].mxu1 }
 0x110   :  { %4396 = vst [vmem:[#allocation19_spill] sm:$0xff] %v3938_v47  ;;  %v3945_v53 = vadd.f32 %v226_v50, %v90_v61  ;;  %v3948_v62 = vadd.f32 %v299_v52, %v3918_v57 }
 0x111   :  { %4397 = vst [vmem:[#allocation20_spill] sm:$0xff] %v3940_v49  ;;  %4398 = vst [vmem:[#allocation21_spill] sm:$0xff] %v3943_v51 }
 0x112   :  { %4399 = vst [vmem:[#allocation22_spill] sm:$0xff] %v3945_v53  ;;  %4400 = vst [vmem:[#allocation23_spill] sm:$0xff] %v3948_v62 }
 0x114   :  { %v230_v63 = vpop.f32.mrb[8].mxu0  ;;  %v303_v2 = vpop.f32.mrb[8].mxu1 }
 0x115   :  { %v3950_v4 = vadd.f32 %v230_v63, %v86_v58  ;;  %v232_v7 = vpop.f32.mrb[9].mxu0  ;;  %v3953_v8 = vadd.f32 %v303_v2, %v3912_v54  ;;  %v305_v19 = vpop.f32.mrb[9].mxu1 }
 0x116   :  { %v3955_v38 = vadd.f32 %v232_v7, %v90_v61  ;;  %v234_v46 = vpop.f32.mrb[10].mxu0  ;;  %v3958_v48 = vadd.f32 %v305_v19, %v3918_v57  ;;  %v307_v50 = vpop.f32.mrb[10].mxu1 }
 0x117   :  { %4401 = vst [vmem:[#allocation24_spill] sm:$0xff] %v3950_v4  ;;  %4402 = vst [vmem:[#allocation25_spill] sm:$0xff] %v3953_v8  ;;  %v3960_v0 = vadd.f32 %v234_v46, %v86_v58  ;;  %v236_v52 = vpop.f32.mrb[11].mxu0  ;;  %v3963_v62 = vadd.f32 %v307_v50, %v3912_v54  ;;  %v309_v63 = vpop.f32.mrb[11].mxu1 }
 0x118   :  { %4403 = vst [vmem:[#allocation26_spill] sm:$0xff] %v3955_v38  ;;  %4404 = vst [vmem:[#allocation27_spill] sm:$0xff] %v3958_v48  ;;  %v3965_v4 = vadd.f32 %v236_v52, %v90_v61  ;;  %v3968_v2 = vadd.f32 %v309_v63, %v3918_v57 }
 0x119   :  { %4405 = vst [vmem:[#allocation28_spill] sm:$0xff] %v3960_v0  ;;  %4406 = vst [vmem:[#allocation29_spill] sm:$0xff] %v3963_v62 }
 0x11a   :  { %4407 = vst [vmem:[#allocation30_spill] sm:$0xff] %v3965_v4  ;;  %4408 = vst [vmem:[#allocation31_spill] sm:$0xff] %v3968_v2 }
 0x11c   :  { %v240_v8 = vpop.f32.mrb[12].mxu0  ;;  %v313_v7 = vpop.f32.mrb[12].mxu1 }
 0x11d   :  { %v3970_v38 = vadd.f32 %v240_v8, %v86_v58  ;;  %v242_v53 = vpop.f32.mrb[13].mxu0  ;;  %v3973_v19 = vadd.f32 %v313_v7, %v3912_v54  ;;  %v315_v46 = vpop.f32.mrb[13].mxu1 }
 0x11e   :  { %v3975_v0 = vadd.f32 %v242_v53, %v90_v61  ;;  %v244_v48 = vpop.f32.mrb[14].mxu0  ;;  %v3978_v50 = vadd.f32 %v315_v46, %v3918_v57  ;;  %v317_v52 = vpop.f32.mrb[14].mxu1  ;;  %v211_v53 = vadd.f32 %v3914_v55, %v86_v58  ;;  %v213_v46 = vadd.f32 %v212_v59, %v90_v61 }
 0x11f   :  { %4409 = vst [vmem:[#allocation32_spill] sm:$0xff] %v3970_v38  ;;  %4410 = vst [vmem:[#allocation33_spill] sm:$0xff] %v3973_v19  ;;  %v3980_v4 = vadd.f32 %v244_v48, %v86_v58  ;;  %v246_v63 = vpop.f32.mrb[15].mxu0  ;;  %v3983_v2 = vadd.f32 %v317_v52, %v3912_v54  ;;  %v319_v8 = vpop.f32.mrb[15].mxu1 }
 0x120   :  { %4411 = vst [vmem:[#allocation34_spill] sm:$0xff] %v3975_v0  ;;  %4412 = vst [vmem:[#allocation35_spill] sm:$0xff] %v3978_v50  ;;  %v3985_v38 = vadd.f32 %v246_v63, %v90_v61  ;;  %v3988_v7 = vadd.f32 %v319_v8, %v3918_v57  ;;  %v284_v0 = vadd.f32 %v3916_v56, %v3912_v54  ;;  %v63_v61 = vld [vmem:[%s4387_s2] sm:$0xff]  ;;  %s3670_s2 = smov [#allocation12]  }
 0x121   :  { %4413 = vst [vmem:[#allocation36_spill] sm:$0xff] %v3980_v4  ;;  %4414 = vst [vmem:[#allocation37_spill] sm:$0xff] %v3983_v2  ;;  %v286_v50 = vadd.f32 %v285_v60, %v3918_v57  ;;  %s2924_s18 = sshll.u32 %s3670_s2, 4  ;;  %s2925_s18 = int_to_ptr.vmem [resolvable:$true] %s2924_s18 }
 0x122   :  { %4415 = vst [vmem:[#allocation38_spill] sm:$0xff] %v3985_v38  ;;  %4416 = vst [vmem:[#allocation39_spill] sm:$0xff] %v3988_v7  ;;  %s3591_s23 = scalar_lea.vmem %s2925_s18, 128  ;;  %p3596_p3 = scmp.lt.s32.totalorder %s2925_s18, %s2925_s18 }
 0x123   :  { %p3592_p2 = scmp.ne.s32.totalorder %s2925_s18, %s3591_s23  ;;  %p3597_p4 = scmp.lt.s32.totalorder %s3591_s23, %s3591_s23 }
 0x124   :  { %v590_v48 = vpop.f32.mrb[16].mxu0  ;;  %v631_v4 = vpop.f32.mrb[16].mxu1 }
 0x125   :  { %v638_v19 = vadd.f32 %v590_v48, %v211_v53  ;;  %v640_v62 = vadd.f32 %v631_v4, %v284_v0  ;;  %v592_v52 = vpop.f32.mrb[17].mxu0  ;;  %v633_v2 = vpop.f32.mrb[17].mxu1  ;;  %v4417_v53 = vmov 0   ;;  %p3598_p5 = por %p3597_p4, %p3596_p3 }
 0x126   :  { %v639_v51 = vadd.f32 %v592_v52, %v213_v46  ;;  %v641_v63 = vadd.f32 %v633_v2, %v286_v50  ;;  %v594_v38 = vpop.f32.mrb[18].mxu0  ;;  %v635_v49 = vpop.f32.mrb[18].mxu1 }
 0x127   :  { %v3010_v8 = vmul.f32 -1.442695, %v638_v19  ;;  %v595_v7 = vpop.f32.mrb[19].mxu0  ;;  %v636_v47 = vpop.f32.mrb[19].mxu1  ;;  %p3599_p6 = pnand %p3598_p5, %p3592_p2 }
 0x128   :  { %v3011_v55 = vmul.f32 -1.442695, %v639_v51  ;;  %v3012_v54 = vmul.f32 -1.442695, %v641_v63 }
 0x129   :  { %3419 = vpow2.f32 %v3010_v8 }
 0x12a   :  { %3421 = vpow2.f32 %v3011_v55 }
 0x12b   :  { %3423 = vpow2.f32 %v3012_v54 }
 0x12c   :  { %3425 = vtanh.f32 %v640_v62 }
 0x133   :  { %v3420_v56 = vpop.eup %3419 }
 0x134   :  { %v3422_v58 = vpop.eup %3421  ;;  %v645_v57 = vadd.f32 1.0, %v3420_v56 }
 0x135   :  { %v651_v59 = vadd.f32 1.0, %v3422_v58  ;;  %v3424_v0 = vpop.eup %3423 }
 0x136   :  { %3427 = vrcp.f32 %v645_v57  ;;  %v3426_v60 = vpop.eup %3425  ;;  %v658_v4 = vadd.f32 1.0, %v3424_v0 }
 0x137   :  { %3429 = vrcp.f32 %v651_v59 }
 0x138   :  { %3431 = vrcp.f32 %v658_v4 }
 0x140   :  { %v3428_v49 = vpop.eup %3427 }
 0x141   :  { %v3430_v47 = vpop.eup %3429  ;;  %v662_v51 = vmul.f32 %v3428_v49, %v3426_v60 }
 0x142   :  { %v661_v38 = vmul.f32 %v3430_v47, %v63_v61  ;;  %v3432_v62 = vpop.eup %3431 }
 0x144   :  { %v3997_v2 = vadd.f32 %v662_v51, %v661_v38 }
 0x146   :  { %3433 = vtanh.f32 %v3997_v2 }
 0x150   :  { %v3434_v19 = vpop.eup %3433 }
 0x151   :  { %v4000_v50 = vmul.f32 %v3434_v19, %v3432_v62 }
 0x153   :  { %v674_v7 = vpack.c.bf16 %v4000_v50, %v4000_v50 }
 0x155   :  { %900 = vmatmul.mubr.bf16.vlgmr.msra.gmra.mrb[20].mxu0 %v674_v7  ;;  %941 = vmatmul.mubr.bf16.vlgmr.msra.gmra.mrb[20].mxu1 %v674_v7 }
 0x156   :  { %1180 = vmatpush1.bf16.msra.mxu0 %v3749_v10  ;;  %1221 = vmatpush1.bf16.msra.mxu1 %v3753_v12 }
 0x157   :  { %1181 = vmatprep.subr.bf16.mxu0 %v3759_v14  ;;  %1222 = vmatprep.subr.bf16.mxu1 %v3765_v16 }
 0x158   :  { %1211 = vmatprep.mubr.bf16.mxu0 %v4417_v53  ;;  %1252 = vmatprep.mubr.bf16.mxu1 %v4417_v53 }
 0x15a   :  { %1182 = vmatpush1.bf16.msra.mxu0 %v3763_v15  ;;  %1223 = vmatpush1.bf16.msra.mxu1 %v3769_v17 }
 0x15b   :  { %1183 = vmatprep.subr.bf16.mxu0 %v3773_v18  ;;  %1224 = vmatprep.subr.bf16.mxu1 %v3780_v20 }
 0x15e   :  { %1184 = vmatpush1.bf16.msra.mxu0 %v3784_v21  ;;  %1225 = vmatpush1.bf16.msra.mxu1 %v3786_v22 }
 0x15f   :  { %1185 = vmatprep.subr.bf16.mxu0 %v3790_v23  ;;  %1226 = vmatprep.subr.bf16.mxu1 %v3792_v24 }
 0x162   :  { %1186 = vmatpush1.bf16.msra.mxu0 %v3796_v25  ;;  %1227 = vmatpush1.bf16.msra.mxu1 %v3800_v26 }
 0x163   :  { %1187 = vmatprep.subr.bf16.mxu0 %v3804_v27  ;;  %1228 = vmatprep.subr.bf16.mxu1 %v3806_v28 }
 0x166   :  { %1188 = vmatpush1.bf16.msra.mxu0 %v3813_v30  ;;  %1229 = vmatpush1.bf16.msra.mxu1 %v3815_v31 }
 0x167   :  { %1189 = vmatprep.subr.bf16.mxu0 %v3819_v32  ;;  %1230 = vmatprep.subr.bf16.mxu1 %v3823_v33 }
 0x16a   :  { %1190 = vmatpush1.bf16.msra.mxu0 %v3827_v34  ;;  %1231 = vmatpush1.bf16.msra.mxu1 %v3829_v35 }
 0x16b   :  { %1191 = vmatprep.subr.bf16.mxu0 %v3833_v36  ;;  %1232 = vmatprep.subr.bf16.mxu1 %v3837_v37 }
 0x16e   :  { %1192 = vmatpush1.bf16.msra.mxu0 %v3844_v39  ;;  %1233 = vmatpush1.bf16.msra.mxu1 %v3846_v40 }
 0x16f   :  { %1193 = vmatprep.subr.bf16.mxu0 %v3848_v41  ;;  %1234 = vmatprep.subr.bf16.mxu1 %v3850_v42 }
 0x172   :  { %1194 = vmatpush1.bf16.msra.mxu0 %v3856_v43  ;;  %1235 = vmatpush1.bf16.msra.mxu1 %v3858_v44 }
 0x173   :  { %1491 = vmatprep.subr.bf16.mxu0 %v3751_v11  ;;  %1532 = vmatprep.subr.bf16.mxu1 %v3755_v13 }
 0x228   :  { %v901_v46 = vpop.f32.mrb[20].mxu0  ;;  %v942_v48 = vpop.f32.mrb[20].mxu1 }
 0x229   :  { %v949_v52 = vadd.f32 %v901_v46, %v3920_v1  ;;  %v951_v63 = vadd.f32 %v942_v48, %v3923_v3  ;;  %v903_v8 = vpop.f32.mrb[21].mxu0  ;;  %v944_v55 = vpop.f32.mrb[21].mxu1 }
 0x22a   :  { %v950_v54 = vadd.f32 %v903_v8, %v3925_v5  ;;  %v952_v56 = vadd.f32 %v944_v55, %v3928_v6  ;;  %v905_v58 = vpop.f32.mrb[22].mxu0  ;;  %v946_v57 = vpop.f32.mrb[22].mxu1  ;;  %v4099_v8 = vld [vmem:[#allocation9 + $0x8] ss:$16 sps:$4 sm:$0xff]   ;;  %v4105_v55 = vld [vmem:[#allocation9 + $0x24] ss:$16 sps:$4 sm:$0xff]  }
 0x22b   :  { %v3045_v59 = vmul.f32 -1.442695, %v949_v52  ;;  %v906_v0 = vpop.f32.mrb[23].mxu0  ;;  %v947_v60 = vpop.f32.mrb[23].mxu1  ;;  %v4111_v58 = vld [vmem:[#allocation9 + $0x28] ss:$16 sps:$4 sm:$0xff]  }
 0x22c   :  { %v3046_v11 = vmul.f32 -1.442695, %v950_v54  ;;  %v3047_v13 = vmul.f32 -1.442695, %v952_v56  ;;  %v4107_v54 = vld [vmem:[#allocation9 + $0x2c] ss:$16 sps:$4 sm:$0xff]  }
 0x22d   :  { %3435 = vpow2.f32 %v3045_v59  ;;  %v4109_v56 = vld [vmem:[#allocation9 + $0x20] ss:$16 sps:$4 sm:$0xff]   ;;  %v4117_v57 = vld [vmem:[#allocation9 + $0x44] ss:$16 sps:$4 sm:$0xff]   ;;  %v4119_v59 = vld [vmem:[#allocation9 + $0x4c] ss:$16 sps:$4 sm:$0xff]  }
 0x22e   :  { %3437 = vpow2.f32 %v3046_v11  ;;  %v4121_v0 = vld [vmem:[#allocation9 + $0x40] ss:$16 sps:$4 sm:$0xff]   ;;  %v4123_v60 = vld [vmem:[#allocation9 + $0x48] ss:$16 sps:$4 sm:$0xff]   ;;  %v4129_v11 = vld [vmem:[#allocation9 + $0x64] ss:$16 sps:$4 sm:$0xff]  }
 0x22f   :  { %3439 = vpow2.f32 %v3047_v13  ;;  %v4131_v13 = vld [vmem:[#allocation9 + $0x6c] ss:$16 sps:$4 sm:$0xff]  }
 0x230   :  { %3441 = vtanh.f32 %v951_v63 }
 0x237   :  { %v3436_v61 = vpop.eup %3435 }
 0x238   :  { %v3438_v49 = vpop.eup %3437  ;;  %v956_v1 = vadd.f32 1.0, %v3436_v61  ;;  %v4133_v61 = vld [vmem:[#allocation9 + $0x60] ss:$16 sps:$4 sm:$0xff]  }
 0x239   :  { %v962_v3 = vadd.f32 1.0, %v3438_v49  ;;  %v3440_v5 = vpop.eup %3439  ;;  %v4135_v49 = vld [vmem:[#allocation9 + $0x68] ss:$16 sps:$4 sm:$0xff]  }
 0x23a   :  { %3443 = vrcp.f32 %v956_v1  ;;  %v3442_v47 = vpop.eup %3441  ;;  %v969_v38 = vadd.f32 1.0, %v3440_v5  ;;  %v4141_v1 = vld [vmem:[#allocation9 + $0x84] ss:$16 sps:$4 sm:$0xff]   ;;  %v4145_v5 = vld [vmem:[#allocation9 + $0x80] ss:$16 sps:$4 sm:$0xff]  }
 0x23b   :  { %3445 = vrcp.f32 %v962_v3  ;;  %v4143_v3 = vld [vmem:[#allocation9 + $0x8c] ss:$16 sps:$4 sm:$0xff]  }
 0x23c   :  { %3447 = vrcp.f32 %v969_v38  ;;  %v4159_v38 = vld [vmem:[#allocation9 + $0xac] ss:$16 sps:$4 sm:$0xff]  }
 0x244   :  { %v3444_v6 = vpop.eup %3443 }
 0x245   :  { %v3446_v51 = vpop.eup %3445  ;;  %v973_v4 = vmul.f32 %v3444_v6, %v3442_v47  ;;  %v4147_v47 = vld [vmem:[#allocation9 + $0x88] ss:$16 sps:$4 sm:$0xff]   ;;  %v4151_v6 = vld [vmem:[#allocation9 + $0xa4] ss:$16 sps:$4 sm:$0xff]  }
 0x246   :  { %v972_v62 = vmul.f32 %v3446_v51, %v3997_v2  ;;  %v3448_v7 = vpop.eup %3447  ;;  %v4095_v2 = vld [vmem:[#allocation9 + $0xc] ss:$16 sps:$4 sm:$0xff]   ;;  %v4155_v51 = vld [vmem:[#allocation9 + $0xa0] ss:$16 sps:$4 sm:$0xff]  }
 0x248   :  { %v4043_v19 = vadd.f32 %v973_v4, %v972_v62  ;;  %v4157_v4 = vld [vmem:[#allocation9 + $0xa8] ss:$16 sps:$4 sm:$0xff]   ;;  %v4162_v62 = vld [vmem:[#allocation9 + $0xc4] ss:$16 sps:$4 sm:$0xff]  }
 0x24a   :  { %3449 = vtanh.f32 %v4043_v19 }
 0x254   :  { %v3450_v46 = vpop.eup %3449 }
 0x255   :  { %v976_v48 = vmul.f32 %v3450_v46, %v3448_v7  ;;  %v4169_v7 = vld [vmem:[#allocation9 + $0xc0] ss:$16 sps:$4 sm:$0xff]   ;;  %v4171_v46 = vld [vmem:[#allocation9 + $0xc8] ss:$16 sps:$4 sm:$0xff]  }
 0x257   :  { %v986_v52 = vpack.c.bf16 %v976_v48, %v976_v48  ;;  %v3277_v63 = vpack.c.bf16 %v976_v48, %v4000_v50  ;;  %v4097_v50 = vld [vmem:[#allocation9] ss:$16 sps:$4 sm:$0xff]   ;;  %v4175_v48 = vld [vmem:[#allocation9 + $0xe4] ss:$16 sps:$4 sm:$0xff]  }
 0x259   :  { %1212 = vmatmul.mubr.bf16.vlgmr.msra.gmra.mrb[24].mxu0 %v986_v52  ;;  %3278 = vst [vmem:[#allocation11] sm:$0xff] %v3277_v63   ;;  %1253 = vmatmul.mubr.bf16.vlgmr.msra.gmra.mrb[24].mxu1 %v986_v52  ;;  %v4177_v52 = vld [vmem:[#allocation9 + $0xec] ss:$16 sps:$4 sm:$0xff]   ;;  %v4181_v63 = vld [vmem:[#allocation9 + $0xe0] ss:$16 sps:$4 sm:$0xff]  }
 0x25a   :  { %1492 = vmatpush1.bf16.msra.mxu0 %v3749_v10  ;;  %1533 = vmatpush1.bf16.msra.mxu1 %v3753_v12 }
 0x25b   :  { %1493 = vmatprep.subr.bf16.mxu0 %v3759_v14  ;;  %1534 = vmatprep.subr.bf16.mxu1 %v3765_v16 }
 0x25c   :  { %1523 = vmatprep.mubr.bf16.mxu0 %v4417_v53  ;;  %1564 = vmatprep.mubr.bf16.mxu1 %v4417_v53 }
 0x25e   :  { %1494 = vmatpush1.bf16.msra.mxu0 %v3763_v15  ;;  %1535 = vmatpush1.bf16.msra.mxu1 %v3769_v17 }
 0x25f   :  { %1495 = vmatprep.subr.bf16.mxu0 %v3773_v18  ;;  %1536 = vmatprep.subr.bf16.mxu1 %v3780_v20  ;;  %v4418_v20 = vld [vmem:[#allocation19_spill] sm:$0xff] }
 0x262   :  { %1496 = vmatpush1.bf16.msra.mxu0 %v3784_v21  ;;  %1537 = vmatpush1.bf16.msra.mxu1 %v3786_v22 }
 0x263   :  { %1497 = vmatprep.subr.bf16.mxu0 %v3790_v23  ;;  %1538 = vmatprep.subr.bf16.mxu1 %v3792_v24 }
 0x266   :  { %1498 = vmatpush1.bf16.msra.mxu0 %v3796_v25  ;;  %1539 = vmatpush1.bf16.msra.mxu1 %v3800_v26 }
 0x267   :  { %1499 = vmatprep.subr.bf16.mxu0 %v3804_v27  ;;  %1540 = vmatprep.subr.bf16.mxu1 %v3806_v28 }
 0x26a   :  { %1500 = vmatpush1.bf16.msra.mxu0 %v3813_v30  ;;  %1541 = vmatpush1.bf16.msra.mxu1 %v3815_v31 }
 0x26b   :  { %1501 = vmatprep.subr.bf16.mxu0 %v3819_v32  ;;  %1542 = vmatprep.subr.bf16.mxu1 %v3823_v33 }
 0x26e   :  { %1502 = vmatpush1.bf16.msra.mxu0 %v3827_v34  ;;  %1543 = vmatpush1.bf16.msra.mxu1 %v3829_v35 }
 0x26f   :  { %1503 = vmatprep.subr.bf16.mxu0 %v3833_v36  ;;  %1544 = vmatprep.subr.bf16.mxu1 %v3837_v37 }
 0x272   :  { %1504 = vmatpush1.bf16.msra.mxu0 %v3844_v39  ;;  %1545 = vmatpush1.bf16.msra.mxu1 %v3846_v40 }
 0x273   :  { %1505 = vmatprep.subr.bf16.mxu0 %v3848_v41  ;;  %1546 = vmatprep.subr.bf16.mxu1 %v3850_v42 }
 0x276   :  { %1506 = vmatpush1.bf16.msra.mxu0 %v3856_v43  ;;  %1547 = vmatpush1.bf16.msra.mxu1 %v3858_v44 }
 0x277   :  { %1844 = vmatprep.subr.bf16.mxu1 %v4095_v2 }
 0x32c   :  { %v1213_v10 = vpop.f32.mrb[24].mxu0  ;;  %v1254_v12 = vpop.f32.mrb[24].mxu1 }
 0x32d   :  { %v1261_v14 = vadd.f32 %v1213_v10, %v3930_v9  ;;  %v1263_v15 = vadd.f32 %v1254_v12, %v3933_v29  ;;  %v1215_v16 = vpop.f32.mrb[25].mxu0  ;;  %v1256_v17 = vpop.f32.mrb[25].mxu1  ;;  %v4183_v10 = vld [vmem:[#allocation9 + $0xe8] ss:$16 sps:$4 sm:$0xff]  }
 0x32e   :  { %v1262_v18 = vadd.f32 %v1215_v16, %v3935_v45  ;;  %v1264_v21 = vadd.f32 %v1256_v17, %v4418_v20  ;;  %v1217_v22 = vpop.f32.mrb[26].mxu0  ;;  %v1258_v23 = vpop.f32.mrb[26].mxu1  ;;  %v4093_v45 = vld [vmem:[#allocation9 + $0x4] ss:$16 sps:$4 sm:$0xff]  }
 0x32f   :  { %v3080_v24 = vmul.f32 -1.442695, %v1261_v14  ;;  %v1218_v25 = vpop.f32.mrb[27].mxu0  ;;  %v1259_v26 = vpop.f32.mrb[27].mxu1  ;;  %1803 = vmatprep.subr.bf16.mxu0 %v4093_v45  ;;  %v4420_v17 = vld [vmem:[#allocation21_spill] sm:$0xff]  ;;  %v4421_v22 = vld [vmem:[#allocation22_spill] sm:$0xff] }
 0x330   :  { %v3081_v27 = vmul.f32 -1.442695, %v1262_v18  ;;  %v3082_v28 = vmul.f32 -1.442695, %v1264_v21 }
 0x331   :  { %3451 = vpow2.f32 %v3080_v24  ;;  %v4422_v24 = vld [vmem:[#allocation23_spill] sm:$0xff] }
 0x332   :  { %3453 = vpow2.f32 %v3081_v27 }
 0x333   :  { %3455 = vpow2.f32 %v3082_v28 }
 0x334   :  { %3457 = vtanh.f32 %v1263_v15  ;;  %v4419_v15 = vld [vmem:[#allocation20_spill] sm:$0xff] }
 0x33b   :  { %v3452_v30 = vpop.eup %3451 }
 0x33c   :  { %v3454_v31 = vpop.eup %3453  ;;  %v1268_v32 = vadd.f32 1.0, %v3452_v30 }
 0x33d   :  { %v1274_v33 = vadd.f32 1.0, %v3454_v31  ;;  %v3456_v34 = vpop.eup %3455 }
 0x33e   :  { %3459 = vrcp.f32 %v1268_v32  ;;  %v3458_v35 = vpop.eup %3457  ;;  %v1281_v40 = vadd.f32 1.0, %v3456_v34 }
 0x33f   :  { %3461 = vrcp.f32 %v1274_v33 }
 0x340   :  { %3463 = vrcp.f32 %v1281_v40 }
 0x348   :  { %v3460_v36 = vpop.eup %3459 }
 0x349   :  { %v3462_v37 = vpop.eup %3461  ;;  %v1285_v39 = vmul.f32 %v3460_v36, %v3458_v35 }
 0x34a   :  { %v1284_v41 = vmul.f32 %v3462_v37, %v4043_v19  ;;  %v3464_v43 = vpop.eup %3463  ;;  %v4164_v19 = vld [vmem:[#allocation9 + $0xcc] ss:$16 sps:$4 sm:$0xff]  }
 0x34c   :  { %v4084_v42 = vadd.f32 %v1285_v39, %v1284_v41 }
 0x34e   :  { %3465 = vtanh.f32 %v4084_v42 }
 0x358   :  { %v3466_v44 = vpop.eup %3465 }
 0x359   :  { %v4087_v9 = vmul.f32 %v3466_v44, %v3464_v43 }
 0x35b   :  { %v1298_v29 = vpack.c.bf16 %v4087_v9, %v4087_v9 }
 0x35d   :  { %1524 = vmatmul.mubr.bf16.vlgmr.msra.gmra.mrb[28].mxu0 %v1298_v29  ;;  %1565 = vmatmul.mubr.bf16.vlgmr.msra.gmra.mrb[28].mxu1 %v1298_v29 }
 0x35e   :  { %1835 = vmatprep.mubr.bf16.mxu0 %v4417_v53  ;;  %1876 = vmatprep.mubr.bf16.mxu1 %v4417_v53 }
 0x35f   :  { %1804 = vmatpush1.bf16.msra.mxu0 %v4097_v50  ;;  %1845 = vmatpush1.bf16.msra.mxu1 %v4099_v8 }
 0x360   :  { %1805 = vmatprep.subr.bf16.mxu0 %v4105_v55  ;;  %1846 = vmatprep.subr.bf16.mxu1 %v4107_v54 }
 0x363   :  { %1806 = vmatpush1.bf16.msra.mxu0 %v4109_v56  ;;  %1847 = vmatpush1.bf16.msra.mxu1 %v4111_v58 }
 0x364   :  { %1807 = vmatprep.subr.bf16.mxu0 %v4117_v57  ;;  %1848 = vmatprep.subr.bf16.mxu1 %v4119_v59 }
 0x367   :  { %1808 = vmatpush1.bf16.msra.mxu0 %v4121_v0  ;;  %1849 = vmatpush1.bf16.msra.mxu1 %v4123_v60 }
 0x368   :  { %1809 = vmatprep.subr.bf16.mxu0 %v4129_v11  ;;  %1850 = vmatprep.subr.bf16.mxu1 %v4131_v13 }
 0x36b   :  { %1810 = vmatpush1.bf16.msra.mxu0 %v4133_v61  ;;  %1851 = vmatpush1.bf16.msra.mxu1 %v4135_v49 }
 0x36c   :  { %1811 = vmatprep.subr.bf16.mxu0 %v4141_v1  ;;  %1852 = vmatprep.subr.bf16.mxu1 %v4143_v3 }
 0x36f   :  { %1812 = vmatpush1.bf16.msra.mxu0 %v4145_v5  ;;  %1853 = vmatpush1.bf16.msra.mxu1 %v4147_v47 }
 0x370   :  { %1813 = vmatprep.subr.bf16.mxu0 %v4151_v6  ;;  %1854 = vmatprep.subr.bf16.mxu1 %v4159_v38 }
 0x373   :  { %1814 = vmatpush1.bf16.msra.mxu0 %v4155_v51  ;;  %1855 = vmatpush1.bf16.msra.mxu1 %v4157_v4 }
 0x374   :  { %1815 = vmatprep.subr.bf16.mxu0 %v4162_v62  ;;  %1856 = vmatprep.subr.bf16.mxu1 %v4164_v19 }
 0x377   :  { %1816 = vmatpush1.bf16.msra.mxu0 %v4169_v7  ;;  %1857 = vmatpush1.bf16.msra.mxu1 %v4171_v46 }
 0x378   :  { %1817 = vmatprep.subr.bf16.mxu0 %v4175_v48  ;;  %1858 = vmatprep.subr.bf16.mxu1 %v4177_v52 }
 0x37b   :  { %1818 = vmatpush1.bf16.msra.mxu0 %v4181_v63  ;;  %1859 = vmatpush1.bf16.msra.mxu1 %v4183_v10 }
 0x37c   :  { %2115 = vmatprep.subr.bf16.mxu0 %v4093_v45  ;;  %2156 = vmatprep.subr.bf16.mxu1 %v4095_v2 }
 0x430   :  { %v1525_v12 = vpop.f32.mrb[28].mxu0  ;;  %v1566_v14 = vpop.f32.mrb[28].mxu1 }
 0x431   :  { %v1573_v16 = vadd.f32 %v1525_v12, %v4419_v15  ;;  %v1575_v18 = vadd.f32 %v1566_v14, %v4420_v17  ;;  %v1527_v20 = vpop.f32.mrb[29].mxu0  ;;  %v1568_v21 = vpop.f32.mrb[29].mxu1 }
 0x432   :  { %v1574_v23 = vadd.f32 %v1527_v20, %v4421_v22  ;;  %v1576_v25 = vadd.f32 %v1568_v21, %v4422_v24  ;;  %v1529_v26 = vpop.f32.mrb[30].mxu0  ;;  %v1570_v27 = vpop.f32.mrb[30].mxu1  ;;  %v4423_v21 = vld [vmem:[#allocation24_spill] sm:$0xff] }
 0x433   :  { %v3115_v28 = vmul.f32 -1.442695, %v1573_v16  ;;  %v1530_v30 = vpop.f32.mrb[31].mxu0  ;;  %v1571_v31 = vpop.f32.mrb[31].mxu1  ;;  %v4425_v27 = vld [vmem:[#allocation26_spill] sm:$0xff] }
 0x434   :  { %v3116_v32 = vmul.f32 -1.442695, %v1574_v23  ;;  %v3117_v33 = vmul.f32 -1.442695, %v1576_v25  ;;  %v4424_v23 = vld [vmem:[#allocation25_spill] sm:$0xff]  ;;  %v4426_v30 = vld [vmem:[#allocation27_spill] sm:$0xff] }
 0x435   :  { %3467 = vpow2.f32 %v3115_v28 }
 0x436   :  { %3469 = vpow2.f32 %v3116_v32 }
 0x437   :  { %3471 = vpow2.f32 %v3117_v33 }
 0x438   :  { %3473 = vtanh.f32 %v1575_v18 }
 0x43f   :  { %v3468_v34 = vpop.eup %3467 }
 0x440   :  { %v3470_v35 = vpop.eup %3469  ;;  %v1580_v36 = vadd.f32 1.0, %v3468_v34 }
 0x441   :  { %v1586_v37 = vadd.f32 1.0, %v3470_v35  ;;  %v3472_v39 = vpop.eup %3471 }
 0x442   :  { %3475 = vrcp.f32 %v1580_v36  ;;  %v3474_v40 = vpop.eup %3473  ;;  %v1593_v29 = vadd.f32 1.0, %v3472_v39 }
 0x443   :  { %3477 = vrcp.f32 %v1586_v37 }
 0x444   :  { %3479 = vrcp.f32 %v1593_v29 }
 0x44c   :  { %v3476_v41 = vpop.eup %3475 }
 0x44d   :  { %v3478_v43 = vpop.eup %3477  ;;  %v1597_v44 = vmul.f32 %v3476_v41, %v3474_v40 }
 0x44e   :  { %v1596_v12 = vmul.f32 %v3478_v43, %v4084_v42  ;;  %v3480_v15 = vpop.eup %3479 }
 0x450   :  { %v4196_v14 = vadd.f32 %v1597_v44, %v1596_v12 }
 0x452   :  { %3481 = vtanh.f32 %v4196_v14 }
 0x45c   :  { %v3482_v16 = vpop.eup %3481 }
 0x45d   :  { %v1600_v17 = vmul.f32 %v3482_v16, %v3480_v15 }
 0x45f   :  { %v1610_v18 = vpack.c.bf16 %v1600_v17, %v1600_v17  ;;  %v3282_v20 = vpack.c.bf16 %v1600_v17, %v4087_v9 }
 0x461   :  { %1836 = vmatmul.mubr.bf16.vlgmr.msra.gmra.mrb[32].mxu0 %v1610_v18  ;;  %3294 = vst [vmem:[#allocation11 + $0x8] sm:$0xff] %v3282_v20   ;;  %1877 = vmatmul.mubr.bf16.vlgmr.msra.gmra.mrb[32].mxu1 %v1610_v18 }
 0x462   :  { %2116 = vmatpush1.bf16.msra.mxu0 %v4097_v50  ;;  %2157 = vmatpush1.bf16.msra.mxu1 %v4099_v8 }
 0x463   :  { %2117 = vmatprep.subr.bf16.mxu0 %v4105_v55  ;;  %2158 = vmatprep.subr.bf16.mxu1 %v4107_v54 }
 0x464   :  { %2147 = vmatprep.mubr.bf16.mxu0 %v4417_v53  ;;  %2188 = vmatprep.mubr.bf16.mxu1 %v4417_v53 }
 0x466   :  { %2118 = vmatpush1.bf16.msra.mxu0 %v4109_v56  ;;  %2159 = vmatpush1.bf16.msra.mxu1 %v4111_v58 }
 0x467   :  { %2119 = vmatprep.subr.bf16.mxu0 %v4117_v57  ;;  %2160 = vmatprep.subr.bf16.mxu1 %v4119_v59 }
 0x46a   :  { %2120 = vmatpush1.bf16.msra.mxu0 %v4121_v0  ;;  %2161 = vmatpush1.bf16.msra.mxu1 %v4123_v60 }
 0x46b   :  { %2121 = vmatprep.subr.bf16.mxu0 %v4129_v11  ;;  %2162 = vmatprep.subr.bf16.mxu1 %v4131_v13 }
 0x46e   :  { %2122 = vmatpush1.bf16.msra.mxu0 %v4133_v61  ;;  %2163 = vmatpush1.bf16.msra.mxu1 %v4135_v49 }
 0x46f   :  { %2123 = vmatprep.subr.bf16.mxu0 %v4141_v1  ;;  %2164 = vmatprep.subr.bf16.mxu1 %v4143_v3 }
 0x472   :  { %2124 = vmatpush1.bf16.msra.mxu0 %v4145_v5  ;;  %2165 = vmatpush1.bf16.msra.mxu1 %v4147_v47 }
 0x473   :  { %2125 = vmatprep.subr.bf16.mxu0 %v4151_v6  ;;  %2166 = vmatprep.subr.bf16.mxu1 %v4159_v38 }
 0x476   :  { %2126 = vmatpush1.bf16.msra.mxu0 %v4155_v51  ;;  %2167 = vmatpush1.bf16.msra.mxu1 %v4157_v4 }
 0x477   :  { %2127 = vmatprep.subr.bf16.mxu0 %v4162_v62  ;;  %2168 = vmatprep.subr.bf16.mxu1 %v4164_v19 }
 0x47a   :  { %2128 = vmatpush1.bf16.msra.mxu0 %v4169_v7  ;;  %2169 = vmatpush1.bf16.msra.mxu1 %v4171_v46 }
 0x47b   :  { %2129 = vmatprep.subr.bf16.mxu0 %v4175_v48  ;;  %2170 = vmatprep.subr.bf16.mxu1 %v4177_v52 }
 0x47e   :  { %2130 = vmatpush1.bf16.msra.mxu0 %v4181_v63  ;;  %2171 = vmatpush1.bf16.msra.mxu1 %v4183_v10 }
 0x47f   :  { %2427 = vmatprep.subr.bf16.mxu0 %v4093_v45  ;;  %2468 = vmatprep.subr.bf16.mxu1 %v4095_v2 }
 0x534   :  { %v1837_v42 = vpop.f32.mrb[32].mxu0  ;;  %v1878_v9 = vpop.f32.mrb[32].mxu1 }
 0x535   :  { %v1885_v22 = vadd.f32 %v1837_v42, %v4423_v21  ;;  %v1887_v24 = vadd.f32 %v1878_v9, %v4424_v23  ;;  %v1839_v25 = vpop.f32.mrb[33].mxu0  ;;  %v1880_v26 = vpop.f32.mrb[33].mxu1 }
 0x536   :  { %v1886_v28 = vadd.f32 %v1839_v25, %v4425_v27  ;;  %v1888_v31 = vadd.f32 %v1880_v26, %v4426_v30  ;;  %v1841_v32 = vpop.f32.mrb[34].mxu0  ;;  %v1882_v33 = vpop.f32.mrb[34].mxu1  ;;  %v4427_v25 = vld [vmem:[#allocation28_spill] sm:$0xff]  ;;  %v4428_v27 = vld [vmem:[#allocation29_spill] sm:$0xff] }
 0x537   :  { %v3150_v34 = vmul.f32 -1.442695, %v1885_v22  ;;  %v1842_v35 = vpop.f32.mrb[35].mxu0  ;;  %v1883_v36 = vpop.f32.mrb[35].mxu1  ;;  %v4429_v32 = vld [vmem:[#allocation30_spill] sm:$0xff] }
 0x538   :  { %v3151_v37 = vmul.f32 -1.442695, %v1886_v28  ;;  %v3152_v39 = vmul.f32 -1.442695, %v1888_v31 }
 0x539   :  { %3483 = vpow2.f32 %v3150_v34  ;;  %v4430_v34 = vld [vmem:[#allocation31_spill] sm:$0xff] }
 0x53a   :  { %3485 = vpow2.f32 %v3151_v37 }
 0x53b   :  { %3487 = vpow2.f32 %v3152_v39 }
 0x53c   :  { %3489 = vtanh.f32 %v1887_v24 }
 0x543   :  { %v3484_v40 = vpop.eup %3483 }
 0x544   :  { %v3486_v41 = vpop.eup %3485  ;;  %v1892_v43 = vadd.f32 1.0, %v3484_v40 }
 0x545   :  { %v1898_v44 = vadd.f32 1.0, %v3486_v41  ;;  %v3488_v29 = vpop.eup %3487 }
 0x546   :  { %3491 = vrcp.f32 %v1892_v43  ;;  %v3490_v12 = vpop.eup %3489  ;;  %v1905_v18 = vadd.f32 1.0, %v3488_v29 }
 0x547   :  { %3493 = vrcp.f32 %v1898_v44 }
 0x548   :  { %3495 = vrcp.f32 %v1905_v18 }
 0x550   :  { %v3492_v15 = vpop.eup %3491 }
 0x551   :  { %v3494_v16 = vpop.eup %3493  ;;  %v1909_v17 = vmul.f32 %v3492_v15, %v3490_v12 }
 0x552   :  { %v1908_v20 = vmul.f32 %v3494_v16, %v4196_v14  ;;  %v3496_v9 = vpop.eup %3495 }
 0x554   :  { %v4239_v42 = vadd.f32 %v1909_v17, %v1908_v20 }
 0x556   :  { %3497 = vtanh.f32 %v4239_v42 }
 0x560   :  { %v3498_v21 = vpop.eup %3497 }
 0x561   :  { %v4242_v22 = vmul.f32 %v3498_v21, %v3496_v9 }
 0x563   :  { %v1922_v23 = vpack.c.bf16 %v4242_v22, %v4242_v22 }
 0x565   :  { %2148 = vmatmul.mubr.bf16.vlgmr.msra.gmra.mrb[36].mxu0 %v1922_v23  ;;  %2189 = vmatmul.mubr.bf16.vlgmr.msra.gmra.mrb[36].mxu1 %v1922_v23 }
 0x566   :  { %2428 = vmatpush1.bf16.msra.mxu0 %v4097_v50  ;;  %2469 = vmatpush1.bf16.msra.mxu1 %v4099_v8 }
 0x567   :  { %2429 = vmatprep.subr.bf16.mxu0 %v4105_v55  ;;  %2470 = vmatprep.subr.bf16.mxu1 %v4107_v54 }
 0x568   :  { %2459 = vmatprep.mubr.bf16.mxu0 %v4417_v53  ;;  %2500 = vmatprep.mubr.bf16.mxu1 %v4417_v53 }
 0x56a   :  { %2430 = vmatpush1.bf16.msra.mxu0 %v4109_v56  ;;  %2471 = vmatpush1.bf16.msra.mxu1 %v4111_v58 }
 0x56b   :  { %2431 = vmatprep.subr.bf16.mxu0 %v4117_v57  ;;  %2472 = vmatprep.subr.bf16.mxu1 %v4119_v59 }
 0x56e   :  { %2432 = vmatpush1.bf16.msra.mxu0 %v4121_v0  ;;  %2473 = vmatpush1.bf16.msra.mxu1 %v4123_v60 }
 0x56f   :  { %2433 = vmatprep.subr.bf16.mxu0 %v4129_v11  ;;  %2474 = vmatprep.subr.bf16.mxu1 %v4131_v13 }
 0x572   :  { %2434 = vmatpush1.bf16.msra.mxu0 %v4133_v61  ;;  %2475 = vmatpush1.bf16.msra.mxu1 %v4135_v49 }
 0x573   :  { %2435 = vmatprep.subr.bf16.mxu0 %v4141_v1  ;;  %2476 = vmatprep.subr.bf16.mxu1 %v4143_v3 }
 0x576   :  { %2436 = vmatpush1.bf16.msra.mxu0 %v4145_v5  ;;  %2477 = vmatpush1.bf16.msra.mxu1 %v4147_v47 }
 0x577   :  { %2437 = vmatprep.subr.bf16.mxu0 %v4151_v6  ;;  %2478 = vmatprep.subr.bf16.mxu1 %v4159_v38 }
 0x57a   :  { %2438 = vmatpush1.bf16.msra.mxu0 %v4155_v51  ;;  %2479 = vmatpush1.bf16.msra.mxu1 %v4157_v4 }
 0x57b   :  { %2439 = vmatprep.subr.bf16.mxu0 %v4162_v62  ;;  %2480 = vmatprep.subr.bf16.mxu1 %v4164_v19 }
 0x57e   :  { %2440 = vmatpush1.bf16.msra.mxu0 %v4169_v7  ;;  %2481 = vmatpush1.bf16.msra.mxu1 %v4171_v46 }
 0x57f   :  { %2441 = vmatprep.subr.bf16.mxu0 %v4175_v48  ;;  %2482 = vmatprep.subr.bf16.mxu1 %v4177_v52 }
 0x582   :  { %2442 = vmatpush1.bf16.msra.mxu0 %v4181_v63  ;;  %2483 = vmatpush1.bf16.msra.mxu1 %v4183_v10 }
 0x583   :  { %2739 = vmatprep.subr.bf16.mxu0 %v4093_v45  ;;  %2780 = vmatprep.subr.bf16.mxu1 %v4095_v2 }
 0x638   :  { %v2149_v14 = vpop.f32.mrb[36].mxu0  ;;  %v2190_v24 = vpop.f32.mrb[36].mxu1 }
 0x639   :  { %v2197_v26 = vadd.f32 %v2149_v14, %v4427_v25  ;;  %v2199_v28 = vadd.f32 %v2190_v24, %v4428_v27  ;;  %v2151_v30 = vpop.f32.mrb[37].mxu0  ;;  %v2192_v31 = vpop.f32.mrb[37].mxu1 }
 0x63a   :  { %v2198_v33 = vadd.f32 %v2151_v30, %v4429_v32  ;;  %v2200_v35 = vadd.f32 %v2192_v31, %v4430_v34  ;;  %v2153_v36 = vpop.f32.mrb[38].mxu0  ;;  %v2194_v37 = vpop.f32.mrb[38].mxu1 }
 0x63b   :  { %v3185_v39 = vmul.f32 -1.442695, %v2197_v26  ;;  %v2154_v40 = vpop.f32.mrb[39].mxu0  ;;  %v2195_v41 = vpop.f32.mrb[39].mxu1 }
 0x63c   :  { %v3186_v45 = vmul.f32 -1.442695, %v2198_v33  ;;  %v3187_v2 = vmul.f32 -1.442695, %v2200_v35  ;;  %v4435_v33 = vld [vmem:[#allocation36_spill] sm:$0xff]  ;;  %v4436_v35 = vld [vmem:[#allocation37_spill] sm:$0xff] }
 0x63d   :  { %3499 = vpow2.f32 %v3185_v39  ;;  %v4437_v40 = vld [vmem:[#allocation38_spill] sm:$0xff] }
 0x63e   :  { %3501 = vpow2.f32 %v3186_v45  ;;  %v4438_v45 = vld [vmem:[#allocation39_spill] sm:$0xff] }
 0x63f   :  { %3503 = vpow2.f32 %v3187_v2 }
 0x640   :  { %3505 = vtanh.f32 %v2199_v28 }
 0x647   :  { %v3500_v43 = vpop.eup %3499 }
 0x648   :  { %v3502_v44 = vpop.eup %3501  ;;  %v2204_v29 = vadd.f32 1.0, %v3500_v43 }
 0x649   :  { %v2210_v12 = vadd.f32 1.0, %v3502_v44  ;;  %v3504_v15 = vpop.eup %3503 }
 0x64a   :  { %3507 = vrcp.f32 %v2204_v29  ;;  %v3506_v16 = vpop.eup %3505  ;;  %v2217_v9 = vadd.f32 1.0, %v3504_v15 }
 0x64b   :  { %3509 = vrcp.f32 %v2210_v12 }
 0x64c   :  { %3511 = vrcp.f32 %v2217_v9 }
 0x654   :  { %v3508_v17 = vpop.eup %3507 }
 0x655   :  { %v3510_v18 = vpop.eup %3509  ;;  %v2221_v20 = vmul.f32 %v3508_v17, %v3506_v16 }
 0x656   :  { %v2220_v21 = vmul.f32 %v3510_v18, %v4239_v42  ;;  %v3512_v14 = vpop.eup %3511 }
 0x658   :  { %v4285_v23 = vadd.f32 %v2221_v20, %v2220_v21 }
 0x65a   :  { %3513 = vtanh.f32 %v4285_v23 }
 0x664   :  { %v3514_v24 = vpop.eup %3513 }
 0x665   :  { %v2224_v25 = vmul.f32 %v3514_v24, %v3512_v14 }
 0x667   :  { %v2234_v26 = vpack.c.bf16 %v2224_v25, %v2224_v25  ;;  %v3287_v27 = vpack.c.bf16 %v2224_v25, %v4242_v22 }
 0x669   :  { %2460 = vmatmul.mubr.bf16.vlgmr.msra.gmra.mrb[40].mxu0 %v2234_v26  ;;  %3295 = vst [vmem:[#allocation11 + $0x10] sm:$0xff] %v3287_v27   ;;  %2501 = vmatmul.mubr.bf16.vlgmr.msra.gmra.mrb[40].mxu1 %v2234_v26 }
 0x66a   :  { %2740 = vmatpush1.bf16.msra.mxu0 %v4097_v50  ;;  %2781 = vmatpush1.bf16.msra.mxu1 %v4099_v8  ;;  %v4431_v8 = vld [vmem:[#allocation32_spill] sm:$0xff] }
 0x66b   :  { %2741 = vmatprep.subr.bf16.mxu0 %v4105_v55  ;;  %2782 = vmatprep.subr.bf16.mxu1 %v4107_v54  ;;  %v4432_v54 = vld [vmem:[#allocation33_spill] sm:$0xff] }
 0x66c   :  { %2771 = vmatprep.mubr.bf16.mxu0 %v4417_v53  ;;  %2812 = vmatprep.mubr.bf16.mxu1 %v4417_v53 }
 0x66e   :  { %2742 = vmatpush1.bf16.msra.mxu0 %v4109_v56  ;;  %2783 = vmatpush1.bf16.msra.mxu1 %v4111_v58 }
 0x66f   :  { %2743 = vmatprep.subr.bf16.mxu0 %v4117_v57  ;;  %2784 = vmatprep.subr.bf16.mxu1 %v4119_v59  ;;  %v4433_v59 = vld [vmem:[#allocation34_spill] sm:$0xff] }
 0x672   :  { %2744 = vmatpush1.bf16.msra.mxu0 %v4121_v0  ;;  %2785 = vmatpush1.bf16.msra.mxu1 %v4123_v60  ;;  %v4434_v60 = vld [vmem:[#allocation35_spill] sm:$0xff] }
 0x673   :  { %2745 = vmatprep.subr.bf16.mxu0 %v4129_v11  ;;  %2786 = vmatprep.subr.bf16.mxu1 %v4131_v13 }
 0x676   :  { %2746 = vmatpush1.bf16.msra.mxu0 %v4133_v61  ;;  %2787 = vmatpush1.bf16.msra.mxu1 %v4135_v49 }
 0x677   :  { %2747 = vmatprep.subr.bf16.mxu0 %v4141_v1  ;;  %2788 = vmatprep.subr.bf16.mxu1 %v4143_v3 }
 0x67a   :  { %2748 = vmatpush1.bf16.msra.mxu0 %v4145_v5  ;;  %2789 = vmatpush1.bf16.msra.mxu1 %v4147_v47 }
 0x67b   :  { %2749 = vmatprep.subr.bf16.mxu0 %v4151_v6  ;;  %2790 = vmatprep.subr.bf16.mxu1 %v4159_v38 }
 0x67e   :  { %2750 = vmatpush1.bf16.msra.mxu0 %v4155_v51  ;;  %2791 = vmatpush1.bf16.msra.mxu1 %v4157_v4 }
 0x67f   :  { %2751 = vmatprep.subr.bf16.mxu0 %v4162_v62  ;;  %2792 = vmatprep.subr.bf16.mxu1 %v4164_v19 }
 0x682   :  { %2752 = vmatpush1.bf16.msra.mxu0 %v4169_v7  ;;  %2793 = vmatpush1.bf16.msra.mxu1 %v4171_v46 }
 0x683   :  { %2753 = vmatprep.subr.bf16.mxu0 %v4175_v48  ;;  %2794 = vmatprep.subr.bf16.mxu1 %v4177_v52 }
 0x686   :  { %2754 = vmatpush1.bf16.msra.mxu0 %v4181_v63  ;;  %2795 = vmatpush1.bf16.msra.mxu1 %v4183_v10 }
 0x73c   :  { %v2461_v53 = vpop.f32.mrb[40].mxu0  ;;  %v2502_v50 = vpop.f32.mrb[40].mxu1 }
 0x73d   :  { %v2509_v55 = vadd.f32 %v2461_v53, %v4431_v8  ;;  %v2511_v56 = vadd.f32 %v2502_v50, %v4432_v54  ;;  %v2463_v58 = vpop.f32.mrb[41].mxu0  ;;  %v2504_v57 = vpop.f32.mrb[41].mxu1 }
 0x73e   :  { %v2510_v0 = vadd.f32 %v2463_v58, %v4433_v59  ;;  %v2512_v11 = vadd.f32 %v2504_v57, %v4434_v60  ;;  %v2465_v13 = vpop.f32.mrb[42].mxu0  ;;  %v2506_v61 = vpop.f32.mrb[42].mxu1 }
 0x73f   :  { %v3220_v49 = vmul.f32 -1.442695, %v2509_v55  ;;  %v2466_v1 = vpop.f32.mrb[43].mxu0  ;;  %v2507_v3 = vpop.f32.mrb[43].mxu1 }
 0x740   :  { %v3221_v5 = vmul.f32 -1.442695, %v2510_v0  ;;  %v3222_v47 = vmul.f32 -1.442695, %v2512_v11 }
 0x741   :  { %3515 = vpow2.f32 %v3220_v49 }
 0x742   :  { %3517 = vpow2.f32 %v3221_v5 }
 0x743   :  { %3519 = vpow2.f32 %v3222_v47 }
 0x744   :  { %3521 = vtanh.f32 %v2511_v56 }
 0x74b   :  { %v3516_v6 = vpop.eup %3515 }
 0x74c   :  { %v3518_v51 = vpop.eup %3517  ;;  %v2516_v4 = vadd.f32 1.0, %v3516_v6 }
 0x74d   :  { %v2522_v38 = vadd.f32 1.0, %v3518_v51  ;;  %v3520_v62 = vpop.eup %3519 }
 0x74e   :  { %3523 = vrcp.f32 %v2516_v4  ;;  %v3522_v19 = vpop.eup %3521  ;;  %v2529_v52 = vadd.f32 1.0, %v3520_v62 }
 0x74f   :  { %3525 = vrcp.f32 %v2522_v38 }
 0x750   :  { %3527 = vrcp.f32 %v2529_v52 }
 0x758   :  { %v3524_v7 = vpop.eup %3523 }
 0x759   :  { %v3526_v46 = vpop.eup %3525  ;;  %v2533_v48 = vmul.f32 %v3524_v7, %v3522_v19 }
 0x75a   :  { %v2532_v63 = vmul.f32 %v3526_v46, %v4285_v23  ;;  %v3528_v42 = vpop.eup %3527 }
 0x75c   :  { %v2534_v10 = vadd.f32 %v2533_v48, %v2532_v63 }
 0x75e   :  { %3529 = vtanh.f32 %v2534_v10 }
 0x768   :  { %v3530_v22 = vpop.eup %3529 }
 0x769   :  { %v4326_v28 = vmul.f32 %v3530_v22, %v3528_v42 }
 0x76b   :  { %v2546_v30 = vpack.c.bf16 %v4326_v28, %v4326_v28 }
 0x76d   :  { %2772 = vmatmul.mubr.bf16.vlgmr.msra.gmra.mrb[44].mxu0 %v2546_v30  ;;  %2813 = vmatmul.mubr.bf16.vlgmr.msra.gmra.mrb[44].mxu1 %v2546_v30 }
 0x840   :  { %v2773_v31 = vpop.f32.mrb[44].mxu0  ;;  %v2814_v32 = vpop.f32.mrb[44].mxu1 }
 0x841   :  { %v2821_v34 = vadd.f32 %v2773_v31, %v4435_v33  ;;  %v2823_v36 = vadd.f32 %v2814_v32, %v4436_v35  ;;  %v2775_v37 = vpop.f32.mrb[45].mxu0  ;;  %v2816_v39 = vpop.f32.mrb[45].mxu1 }
 0x842   :  { %v2822_v41 = vadd.f32 %v2775_v37, %v4437_v40  ;;  %v2824_v2 = vadd.f32 %v2816_v39, %v4438_v45  ;;  %v2777_v43 = vpop.f32.mrb[46].mxu0  ;;  %v2818_v44 = vpop.f32.mrb[46].mxu1 }
 0x843   :  { %v3255_v29 = vmul.f32 -1.442695, %v2821_v34  ;;  %v2778_v12 = vpop.f32.mrb[47].mxu0  ;;  %v2819_v15 = vpop.f32.mrb[47].mxu1 }
 0x844   :  { %v3256_v16 = vmul.f32 -1.442695, %v2822_v41  ;;  %v3257_v17 = vmul.f32 -1.442695, %v2824_v2 }
 0x845   :  { %3531 = vpow2.f32 %v3255_v29 }
 0x846   :  { %3533 = vpow2.f32 %v3256_v16 }
 0x847   :  { %3535 = vpow2.f32 %v3257_v17 }
 0x848   :  { %3537 = vtanh.f32 %v2823_v36 }
 0x84f   :  { %v3532_v18 = vpop.eup %3531 }
 0x850   :  { %v3534_v20 = vpop.eup %3533  ;;  %v2828_v9 = vadd.f32 1.0, %v3532_v18 }
 0x851   :  { %v2834_v21 = vadd.f32 1.0, %v3534_v20  ;;  %v3536_v23 = vpop.eup %3535 }
 0x852   :  { %3539 = vrcp.f32 %v2828_v9  ;;  %v3538_v14 = vpop.eup %3537  ;;  %v2841_v27 = vadd.f32 1.0, %v3536_v23 }
 0x853   :  { %3541 = vrcp.f32 %v2834_v21 }
 0x854   :  { %3543 = vrcp.f32 %v2841_v27 }
 0x85c   :  { %v3540_v24 = vpop.eup %3539 }
 0x85d   :  { %v3542_v25 = vpop.eup %3541  ;;  %v2845_v26 = vmul.f32 %v3540_v24, %v3538_v14 }
 0x85e   :  { %v2844_v53 = vmul.f32 %v3542_v25, %v2534_v10  ;;  %v3544_v8 = vpop.eup %3543 }
 0x860   :  { %v2846_v50 = vadd.f32 %v2845_v26, %v2844_v53 }
 0x862   :  { %3545 = vtanh.f32 %v2846_v50  ;;  %2905 = vst [vmem:[#allocation14] sm:$0xff] %v2846_v50 }
 0x86c   :  { %v3546_v55 = vpop.eup %3545 }
 0x86d   :  { %v2848_v54 = vmul.f32 %v3546_v55, %v3544_v8 }
 0x86f   :  { %v3292_v56 = vpack.c.bf16 %v2848_v54, %v4326_v28  ;;  %2904 = vst [vmem:[#allocation12] sm:$0xff] %v2848_v54 }
 0x870   :  { %3602 = shalt.err (!%p3599_p6)
}
 0x871   :  { %s3603_s26 = scalar_lea.hbm %s4392_s7, 128 }
 0x872   :  { %p3604_p7 = scmp.ne.s32.totalorder %s4392_s7, %s3603_s26  ;;  %p3607_p8 = scmp.lt.u32.totalorder %s3603_s26, %s4392_s7 }
 0x874   :  { %p3609_p9 = pnand %p3607_p8, %p3604_p7 }
 0x876   :  { %3612 = shalt.err (!%p3609_p9)
}
 0x877   :  { %2927 = dma.vmem_to_hbm [thread:$0]  %s2925_s18, 128, %s4392_s7, [#allocation13]   ;;  %3296 = vst [vmem:[#allocation11 + $0x18] sm:$0xff] %v3292_v56  }
 0x878   :  { %s3613_s9 = scalar_lea.vmem %s4336_s22, 128  ;;  %p3618_p11 = scmp.lt.s32.totalorder %s4336_s22, %s4336_s22 }
 0x879   :  { %p3614_p10 = scmp.ne.s32.totalorder %s4336_s22, %s3613_s9  ;;  %p3619_p12 = scmp.lt.s32.totalorder %s3613_s9, %s3613_s9 }
 0x87b   :  { %p3620_p13 = por %p3619_p12, %p3618_p11 }
 0x87d   :  { %p3621_p0 = pnand %p3620_p13, %p3614_p10 }
 0x87f   :  { %3624 = shalt.err (!%p3621_p0)
}
 0x880   :  { %s3625_s12 = scalar_lea.hbm %s4393_s8, 128 }
 0x881   :  { %p3626_p1 = scmp.ne.s32.totalorder %s4393_s8, %s3625_s12  ;;  %p3629_p2 = scmp.lt.u32.totalorder %s3625_s12, %s4393_s8 }
 0x883   :  { %p3631_p3 = pnand %p3629_p2, %p3626_p1 }
 0x885   :  { %3634 = shalt.err (!%p3631_p3)
}
 0x886   :  { %2937 = dma.vmem_to_hbm [thread:$0]  %s4336_s22, 128, %s4393_s8, [#allocation13]  }
 0x887   :  { %s3635_s16 = scalar_lea.vmem %s4334_s20, 512  ;;  %p3640_p5 = scmp.lt.s32.totalorder %s4334_s20, %s4334_s20 }
 0x888   :  { %p3636_p4 = scmp.ne.s32.totalorder %s4334_s20, %s3635_s16  ;;  %p3641_p6 = scmp.lt.s32.totalorder %s3635_s16, %s3635_s16 }
 0x88a   :  { %p3642_p7 = por %p3641_p6, %p3640_p5 }
 0x88c   :  { %p3643_p8 = pnand %p3642_p7, %p3636_p4 }
 0x88e   :  { %3646 = shalt.err (!%p3643_p8)
}
 0x88f   :  { %s3647_s2 = scalar_lea.hbm %s4391_s6, 512 }
 0x890   :  { %p3648_p9 = scmp.ne.s32.totalorder %s4391_s6, %s3647_s2  ;;  %p3651_p10 = scmp.lt.u32.totalorder %s3647_s2, %s4391_s6 }
 0x892   :  { %p3653_p11 = pnand %p3651_p10, %p3648_p9 }
 0x894   :  { %3656 = shalt.err (!%p3653_p11)
}
 0x895   :  { %s3673_s8 = smov 64   ;;  %s3674_s22 = smov 4  }
 0x896   :  { %2917 = dma.vmem_to_hbm [thread:$0]  %s4334_s20, 512, %s4391_s6, [#allocation8], %s3673_s8, %s3673_s8, %s3674_s22  }
 0x897   :  { %3661 = dma.done.wait [#allocation8], 512  }
 0x898   :  { %3662 = vsyncadd [#allocation8], 4294966784 }
 0x899   :  { %3663 = dma.done.wait [#allocation13], 256  }
 0x89a   :  { %3664 = vsyncadd [#allocation13], 4294967040 }
 0x89b   :  { %2947 = vsyncpa [#allocation7], 1 }
 0x89c   :  { %2948 = vsyncpa [#allocation10], 1 }
 0x89d   :  { %2949 = vsyncpa [#allocation8], 1 }
 0x89e   :  { %2950 = vsyncpa [#allocation13], 1 }

</bundles_post_ra>
